<compile_context>
chip_gen: v6e
topology: v6e:2x2x1
jax: 0.10.0
libtpu: 0.0.40
codegen_flags: <defaults>
</compile_context>

<pallas_src>
import numpy as np

import jax
import jax.numpy as jnp
from jax.experimental import pallas as pl
from jax.experimental.pallas import tpu as pltpu


# ------------------------------ Pallas kernel ------------------------------

def _net_kernel(x_ref, w1_ref, b1_ref, selw_ref, rowsel_ref, w2_ref, b2_ref,
                fc1w_ref, fc1b_ref, fc2w_ref, fc2b_ref, fc3w_ref, fc3b_ref,
                out_ref, pool_scr):
    """Forward pass for ONE image (grid is over the batch)."""
    f32 = jnp.float32
    bf16 = jnp.bfloat16

    # --- conv1 (3->4, k=5) + ReLU: 5 banded row-GEMMs, LHS is a full-width
    # (24, 84) row block, output lanes = 4*jo + co (lane dense).
    acc1 = jnp.zeros((24, 96), f32)
    for di in range(5):
        acc1 = acc1 + jnp.dot(x_ref[0, di:di + 24, :], w1_ref[di],
                              preferred_element_type=f32)
    y1 = jnp.maximum(acc1 + b1_ref[...], 0.0).astype(bf16)          # (24, 96)

    # --- 2x2 max pool via 0/1 selection matmuls (MXU has huge slack):
    # width: pick even / odd column pairs and compact 96 -> 48 lanes.
    yw = jnp.maximum(
        jnp.dot(y1, selw_ref[0], preferred_element_type=f32),
        jnp.dot(y1, selw_ref[1], preferred_element_type=f32)).astype(bf16)
    # height: pick even / odd rows and compact 24 -> 12 rows.
    pooled = jnp.maximum(
        jnp.dot(rowsel_ref[0], yw, preferred_element_type=f32),
        jnp.dot(rowsel_ref[1], yw, preferred_element_type=f32))     # (12, 48)
    pool_scr[...] = pooled      # single lane-dense store; re-read row blocks

    # --- conv2 (4->10, k=5) + ReLU: 5 banded row-GEMMs, LHS = (8, 48) block.
    acc2 = jnp.zeros((8, 80), f32)
    for di in range(5):
        acc2 = acc2 + jnp.dot(pool_scr[di:di + 8, :].astype(bf16), w2_ref[di],
                              preferred_element_type=f32)
    y2 = jnp.maximum(acc2 + b2_ref[...], 0.0).astype(bf16)          # (8, 80)

    # --- fc1 without the flatten scatter: 8 accumulated (1,80)@(80,150) dots
    # against the pre-permuted (8, 80, 150) weight.
    h1 = fc1b_ref[...]                                              # (1, 150)
    for io in range(8):
        h1 = h1 + jnp.dot(y2[io:io + 1, :], fc1w_ref[io],
                          preferred_element_type=f32)
    h1 = jnp.maximum(h1, 0.0).astype(bf16)

    # --- fc2 -> fc3 entirely in registers.
    h2 = jnp.maximum(
        jnp.dot(h1, fc2w_ref[...], preferred_element_type=f32) + fc2b_ref[...],
        0.0).astype(bf16)
    out = jnp.dot(h2, fc3w_ref[...], preferred_element_type=f32) + fc3b_ref[...]
    out_ref[...] = out[None].astype(out_ref.dtype)                  # (1,1,10)


def net_forward(x_nchw, prep):
    n = x_nchw.shape[0]
    # NHWC, then fold (w, ci) onto the lane axis -> (N, 28, 84), bf16 input.
    x = jnp.transpose(x_nchw, (0, 2, 3, 1)).reshape(n, 28, 28 * 3)
    x = x.astype(jnp.bfloat16)

    operands = (x, prep["w1b"], prep["b1"], prep["selw"], prep["rowsel"],
                prep["w2b"], prep["b2"], prep["fc1w3"], prep["fc1b"],
                prep["fc2wT"], prep["fc2b"], prep["fc3wT"], prep["fc3b"])

    def const_spec(a):
        return pl.BlockSpec(a.shape, lambda i, _n=a.ndim: (0,) * _n)

    in_specs = [pl.BlockSpec((1, 28, 84), lambda i: (i, 0, 0))]
    in_specs += [const_spec(a) for a in operands[1:]]

    out = pl.pallas_call(
        _net_kernel,
        out_shape=jax.ShapeDtypeStruct((n, 1, 10), jnp.float32),
        grid_spec=pltpu.PrefetchScalarGridSpec(
            num_scalar_prefetch=0,
            grid=(n,),
            in_specs=in_specs,
            out_specs=pl.BlockSpec((1, 1, 10), lambda i: (i, 0, 0)),
            scratch_shapes=[pltpu.VMEM((12, 48), jnp.float32)]),
        compiler_params=pltpu.CompilerParams(
            dimension_semantics=("parallel",)),
    )(*operands)
    return out.reshape(n, 10)


# ----------------------- one-time parameter preparation ---------------------

def prepare_params(p):
    """Reshuffle PyTorch-layout weights into kernel layouts (host-side, free)."""
    w1 = np.asarray(p["conv1_w"], np.float32)            # (4, 3, 5, 5)
    w2 = np.asarray(p["conv2_w"], np.float32)            # (10, 4, 5, 5)

    # Banded conv1 weights (5, 84, 96):
    #   W[di][3*(jo+dj)+ci, 4*jo+co] = w1[co, ci, di, dj]
    w1b = np.zeros((5, 84, 96), np.float32)
    for di in range(5):
        for dj in range(5):
            for jo in range(24):
                w1b[di, 3 * (jo + dj):3 * (jo + dj) + 3,
                    4 * jo:4 * jo + 4] = w1[:, :, di, dj].T
    # Banded conv2 weights (5, 48, 80):
    #   W[di][4*(jo+dj)+ci, 10*jo+co] = w2[co, ci, di, dj]
    w2b = np.zeros((5, 48, 80), np.float32)
    for di in range(5):
        for dj in range(5):
            for jo in range(8):
                w2b[di, 4 * (jo + dj):4 * (jo + dj) + 4,
                    10 * jo:10 * jo + 10] = w2[:, :, di, dj].T

    # Width-pool lane selection (96 -> 48): even / odd member of each 2-pair.
    selw = np.zeros((2, 96, 48), np.float32)
    for jo in range(12):
        for co in range(4):
            selw[0, 4 * (2 * jo) + co, 4 * jo + co] = 1.0
            selw[1, 4 * (2 * jo + 1) + co, 4 * jo + co] = 1.0
    # Height-pool row selection (24 -> 12): even / odd row of each pair.
    rowsel = np.zeros((2, 12, 24), np.float32)
    for m in range(12):
        rowsel[0, m, 2 * m] = 1.0
        rowsel[1, m, 2 * m + 1] = 1.0

    # fc1: PyTorch flatten order (co*64 + io*8 + jo) -> kernel order
    # [io, 10*jo + co, f] so the kernel never flattens / transposes activations.
    fc1w = np.asarray(p["fc1_w"], np.float32).reshape(150, 10, 8, 8)  # [f,co,io,jo]
    fc1w3 = np.transpose(fc1w, (2, 3, 1, 0)).reshape(8, 80, 150)      # [io,10jo+co,f]

    bf = jnp.bfloat16
    return {
        "w1b": jnp.asarray(w1b, bf),
        "b1": jnp.asarray(np.tile(np.asarray(p["conv1_b"]), 24)[None, :],
                          jnp.float32),                               # (1, 96)
        "selw": jnp.asarray(selw, bf),
        "rowsel": jnp.asarray(rowsel, bf),
        "w2b": jnp.asarray(w2b, bf),
        "b2": jnp.asarray(np.tile(np.asarray(p["conv2_b"]), 8)[None, :],
                          jnp.float32),                               # (1, 80)
        "fc1w3": jnp.asarray(fc1w3, bf),
        "fc1b": jnp.asarray(np.asarray(p["fc1_b"])[None, :], jnp.float32),
        "fc2wT": jnp.asarray(np.asarray(p["fc2_w"]).T, bf),           # (150, 80)
        "fc2b": jnp.asarray(np.asarray(p["fc2_b"])[None, :], jnp.float32),
        "fc3wT": jnp.asarray(np.asarray(p["fc3_w"]).T, bf),           # (80, 10)
        "fc3b": jnp.asarray(np.asarray(p["fc3_b"])[None, :], jnp.float32),
    }


def init_params(key):
    def uniform(key, shape, fan_in):
        bound = 1.0 / jnp.sqrt(jnp.float32(fan_in))
        return jax.random.uniform(key, shape, jnp.float32, -bound, bound)

    ks = jax.random.split(key, 10)
    return {
        "conv1_w": uniform(ks[0], (4, 3, 5, 5), 3 * 5 * 5),
        "conv1_b": uniform(ks[1], (4,), 3 * 5 * 5),
        "conv2_w": uniform(ks[2], (10, 4, 5, 5), 4 * 5 * 5),
        "conv2_b": uniform(ks[3], (10,), 4 * 5 * 5),
        "fc1_w": uniform(ks[4], (150, 8 * 8 * 10), 8 * 8 * 10),
        "fc1_b": uniform(ks[5], (150,), 8 * 8 * 10),
        "fc2_w": uniform(ks[6], (80, 150), 150),
        "fc2_b": uniform(ks[7], (80,), 150),
        "fc3_w": uniform(ks[8], (10, 80), 80),
        "fc3_b": uniform(ks[9], (10,), 80),
    }


# ----------------------------- pure-JAX reference ---------------------------

def _reference_forward(x, p):
    hi = jax.lax.Precision.HIGHEST
    dn = ("NCHW", "OIHW", "NCHW")
    y = jax.lax.conv_general_dilated(x, p["conv1_w"], (1, 1), "VALID",
                                     dimension_numbers=dn, precision=hi)
    y = jnp.maximum(y + p["conv1_b"][None, :, None, None], 0.0)
    y = jax.lax.reduce_window(y, -jnp.inf, jax.lax.max,
                              (1, 1, 2, 2), (1, 1, 2, 2), "VALID")
    y = jax.lax.conv_general_dilated(y, p["conv2_w"], (1, 1), "VALID",
                                     dimension_numbers=dn, precision=hi)
    y = jnp.maximum(y + p["conv2_b"][None, :, None, None], 0.0)
    y = y.reshape(y.shape[0], -1)
    y = jnp.maximum(jnp.dot(y, p["fc1_w"].T, precision=hi) + p["fc1_b"], 0.0)
    y = jnp.maximum(jnp.dot(y, p["fc2_w"].T, precision=hi) + p["fc2_b"], 0.0)
    return jnp.dot(y, p["fc3_w"].T, precision=hi) + p["fc3_b"]


if __name__ == "__main__":
    key = jax.random.PRNGKey(0)
    k_params, k_x = jax.random.split(key)
    params = init_params(k_params)
    prep = prepare_params(params)
    # fc1 expects 8*8*10 features -> input is (N, 3, 28, 28)
    x = jax.random.normal(k_x, (2, 3, 28, 28), jnp.float32)

    out = jax.jit(net_forward)(x, prep)
    out = jax.block_until_ready(out)
    assert out.shape == (2, 10) and out.dtype == jnp.float32

    # Reference is f32 / Precision.HIGHEST; the kernel feeds bf16 to the MXU
    # (f32 accumulation), so allow a bf16-regime tolerance (typical err ~5e-3).
    ref = _reference_forward(x, params)
    rel_err = jnp.linalg.norm(out - ref) / jnp.linalg.norm(ref)
    assert float(rel_err) < 2e-2, float(rel_err)
    print("KERNEL_OK")
</pallas_src>

<mosaic_0001>
module attributes {stable_mosaic.version = 11 : i64} {
  func.func @_net_kernel(%arg0: i32, %arg1: memref<1x28x84xbf16, #tpu.memory_space<vmem>>, %arg2: memref<5x84x96xbf16, #tpu.memory_space<vmem>>, %arg3: memref<1x96xf32, #tpu.memory_space<vmem>>, %arg4: memref<2x96x48xbf16, #tpu.memory_space<vmem>>, %arg5: memref<2x12x24xbf16, #tpu.memory_space<vmem>>, %arg6: memref<5x48x80xbf16, #tpu.memory_space<vmem>>, %arg7: memref<1x80xf32, #tpu.memory_space<vmem>>, %arg8: memref<8x80x150xbf16, #tpu.memory_space<vmem>>, %arg9: memref<1x150xf32, #tpu.memory_space<vmem>>, %arg10: memref<150x80xbf16, #tpu.memory_space<vmem>>, %arg11: memref<1x80xf32, #tpu.memory_space<vmem>>, %arg12: memref<80x10xbf16, #tpu.memory_space<vmem>>, %arg13: memref<1x10xf32, #tpu.memory_space<vmem>>, %arg14: memref<1x1x10xf32, #tpu.memory_space<vmem>>, %arg15: memref<12x48xf32, #tpu.memory_space<vmem>>) attributes {dimension_semantics = [#tpu.dimension_semantics<parallel>], iteration_bounds = array<i64: 2>, scalar_prefetch = 0 : i64, scratch_operands = 1 : i64, tpu.core_type = #tpu.core_type<tc>, window_params = [{transform_indices = @transform_0, window_bounds = array<i64: 1, 28, 84>}, {pipeline_mode = #tpu.pipeline_mode<synchronous>, transform_indices = @transform_1, window_bounds = array<i64: 5, 84, 96>}, {pipeline_mode = #tpu.pipeline_mode<synchronous>, transform_indices = @transform_2, window_bounds = array<i64: 1, 96>}, {pipeline_mode = #tpu.pipeline_mode<synchronous>, transform_indices = @transform_3, window_bounds = array<i64: 2, 96, 48>}, {pipeline_mode = #tpu.pipeline_mode<synchronous>, transform_indices = @transform_4, window_bounds = array<i64: 2, 12, 24>}, {pipeline_mode = #tpu.pipeline_mode<synchronous>, transform_indices = @transform_5, window_bounds = array<i64: 5, 48, 80>}, {pipeline_mode = #tpu.pipeline_mode<synchronous>, transform_indices = @transform_6, window_bounds = array<i64: 1, 80>}, {pipeline_mode = #tpu.pipeline_mode<synchronous>, transform_indices = @transform_7, window_bounds = array<i64: 8, 80, 150>}, {pipeline_mode = #tpu.pipeline_mode<synchronous>, transform_indices = @transform_8, window_bounds = array<i64: 1, 150>}, {pipeline_mode = #tpu.pipeline_mode<synchronous>, transform_indices = @transform_9, window_bounds = array<i64: 150, 80>}, {pipeline_mode = #tpu.pipeline_mode<synchronous>, transform_indices = @transform_10, window_bounds = array<i64: 1, 80>}, {pipeline_mode = #tpu.pipeline_mode<synchronous>, transform_indices = @transform_11, window_bounds = array<i64: 80, 10>}, {pipeline_mode = #tpu.pipeline_mode<synchronous>, transform_indices = @transform_12, window_bounds = array<i64: 1, 10>}, {transform_indices = @transform_13, window_bounds = array<i64: 1, 1, 10>}]} {
    %cst = arith.constant 0.000000e+00 : f32
    %0 = vector.broadcast %cst : f32 to vector<24x96xf32>
    %c0 = arith.constant 0 : index
    %c0_0 = arith.constant 0 : index
    %c0_1 = arith.constant 0 : index
    %1 = vector.load %arg1[%c0, %c0_0, %c0_1] : memref<1x28x84xbf16, #tpu.memory_space<vmem>>, vector<1x24x84xbf16>
    %2 = vector.shape_cast %1 : vector<1x24x84xbf16> to vector<24x84xbf16>
    %c0_2 = arith.constant 0 : index
    %c0_3 = arith.constant 0 : index
    %c0_4 = arith.constant 0 : index
    %3 = vector.load %arg2[%c0_2, %c0_3, %c0_4] : memref<5x84x96xbf16, #tpu.memory_space<vmem>>, vector<1x84x96xbf16>
    %4 = vector.shape_cast %3 : vector<1x84x96xbf16> to vector<84x96xbf16>
    %cst_5 = arith.constant dense<0.000000e+00> : vector<24x96xf32>
    %5 = tpu.matmul %2, %4, %cst_5 {dimension_numbers = #tpu.dot_dimension_numbers<[1], [0], [0], [1], [0, 0, 1, 1], [], []>} : vector<24x84xbf16>, vector<84x96xbf16>, vector<24x96xf32> -> vector<24x96xf32>
    %6 = arith.addf %0, %5 : vector<24x96xf32>
    %c0_6 = arith.constant 0 : index
    %c1 = arith.constant 1 : index
    %c0_7 = arith.constant 0 : index
    %7 = vector.load %arg1[%c0_6, %c1, %c0_7] : memref<1x28x84xbf16, #tpu.memory_space<vmem>>, vector<1x24x84xbf16>
    %8 = vector.shape_cast %7 : vector<1x24x84xbf16> to vector<24x84xbf16>
    %c1_8 = arith.constant 1 : index
    %c0_9 = arith.constant 0 : index
    %c0_10 = arith.constant 0 : index
    %9 = vector.load %arg2[%c1_8, %c0_9, %c0_10] : memref<5x84x96xbf16, #tpu.memory_space<vmem>>, vector<1x84x96xbf16>
    %10 = vector.shape_cast %9 : vector<1x84x96xbf16> to vector<84x96xbf16>
    %cst_11 = arith.constant dense<0.000000e+00> : vector<24x96xf32>
    %11 = tpu.matmul %8, %10, %cst_11 {dimension_numbers = #tpu.dot_dimension_numbers<[1], [0], [0], [1], [0, 0, 1, 1], [], []>} : vector<24x84xbf16>, vector<84x96xbf16>, vector<24x96xf32> -> vector<24x96xf32>
    %12 = arith.addf %6, %11 : vector<24x96xf32>
    %c0_12 = arith.constant 0 : index
    %c2 = arith.constant 2 : index
    %c0_13 = arith.constant 0 : index
    %13 = vector.load %arg1[%c0_12, %c2, %c0_13] : memref<1x28x84xbf16, #tpu.memory_space<vmem>>, vector<1x24x84xbf16>
    %14 = vector.shape_cast %13 : vector<1x24x84xbf16> to vector<24x84xbf16>
    %c2_14 = arith.constant 2 : index
    %c0_15 = arith.constant 0 : index
    %c0_16 = arith.constant 0 : index
    %15 = vector.load %arg2[%c2_14, %c0_15, %c0_16] : memref<5x84x96xbf16, #tpu.memory_space<vmem>>, vector<1x84x96xbf16>
    %16 = vector.shape_cast %15 : vector<1x84x96xbf16> to vector<84x96xbf16>
    %cst_17 = arith.constant dense<0.000000e+00> : vector<24x96xf32>
    %17 = tpu.matmul %14, %16, %cst_17 {dimension_numbers = #tpu.dot_dimension_numbers<[1], [0], [0], [1], [0, 0, 1, 1], [], []>} : vector<24x84xbf16>, vector<84x96xbf16>, vector<24x96xf32> -> vector<24x96xf32>
    %18 = arith.addf %12, %17 : vector<24x96xf32>
    %c0_18 = arith.constant 0 : index
    %c3 = arith.constant 3 : index
    %c0_19 = arith.constant 0 : index
    %19 = vector.load %arg1[%c0_18, %c3, %c0_19] : memref<1x28x84xbf16, #tpu.memory_space<vmem>>, vector<1x24x84xbf16>
    %20 = vector.shape_cast %19 : vector<1x24x84xbf16> to vector<24x84xbf16>
    %c3_20 = arith.constant 3 : index
    %c0_21 = arith.constant 0 : index
    %c0_22 = arith.constant 0 : index
    %21 = vector.load %arg2[%c3_20, %c0_21, %c0_22] : memref<5x84x96xbf16, #tpu.memory_space<vmem>>, vector<1x84x96xbf16>
    %22 = vector.shape_cast %21 : vector<1x84x96xbf16> to vector<84x96xbf16>
    %cst_23 = arith.constant dense<0.000000e+00> : vector<24x96xf32>
    %23 = tpu.matmul %20, %22, %cst_23 {dimension_numbers = #tpu.dot_dimension_numbers<[1], [0], [0], [1], [0, 0, 1, 1], [], []>} : vector<24x84xbf16>, vector<84x96xbf16>, vector<24x96xf32> -> vector<24x96xf32>
    %24 = arith.addf %18, %23 : vector<24x96xf32>
    %c0_24 = arith.constant 0 : index
    %c4 = arith.constant 4 : index
    %c0_25 = arith.constant 0 : index
    %25 = vector.load %arg1[%c0_24, %c4, %c0_25] : memref<1x28x84xbf16, #tpu.memory_space<vmem>>, vector<1x24x84xbf16>
    %26 = vector.shape_cast %25 : vector<1x24x84xbf16> to vector<24x84xbf16>
    %c4_26 = arith.constant 4 : index
    %c0_27 = arith.constant 0 : index
    %c0_28 = arith.constant 0 : index
    %27 = vector.load %arg2[%c4_26, %c0_27, %c0_28] : memref<5x84x96xbf16, #tpu.memory_space<vmem>>, vector<1x84x96xbf16>
    %28 = vector.shape_cast %27 : vector<1x84x96xbf16> to vector<84x96xbf16>
    %cst_29 = arith.constant dense<0.000000e+00> : vector<24x96xf32>
    %29 = tpu.matmul %26, %28, %cst_29 {dimension_numbers = #tpu.dot_dimension_numbers<[1], [0], [0], [1], [0, 0, 1, 1], [], []>} : vector<24x84xbf16>, vector<84x96xbf16>, vector<24x96xf32> -> vector<24x96xf32>
    %30 = arith.addf %24, %29 : vector<24x96xf32>
    %c0_30 = arith.constant 0 : index
    %c0_31 = arith.constant 0 : index
    %31 = vector.load %arg3[%c0_30, %c0_31] : memref<1x96xf32, #tpu.memory_space<vmem>>, vector<1x96xf32>
    %32 = vector.broadcast %31 : vector<1x96xf32> to vector<24x96xf32>
    %33 = arith.addf %30, %32 : vector<24x96xf32>
    %cst_32 = arith.constant 0.000000e+00 : f32
    %34 = vector.broadcast %cst_32 : f32 to vector<24x96xf32>
    %35 = arith.maximumf %33, %34 : vector<24x96xf32>
    %36 = arith.truncf %35 : vector<24x96xf32> to vector<24x96xbf16>
    %c0_33 = arith.constant 0 : index
    %c0_34 = arith.constant 0 : index
    %c0_35 = arith.constant 0 : index
    %37 = vector.load %arg4[%c0_33, %c0_34, %c0_35] : memref<2x96x48xbf16, #tpu.memory_space<vmem>>, vector<1x96x48xbf16>
    %38 = vector.shape_cast %37 : vector<1x96x48xbf16> to vector<96x48xbf16>
    %cst_36 = arith.constant dense<0.000000e+00> : vector<24x48xf32>
    %39 = tpu.matmul %36, %38, %cst_36 {dimension_numbers = #tpu.dot_dimension_numbers<[1], [0], [0], [1], [0, 0, 1, 1], [], []>} : vector<24x96xbf16>, vector<96x48xbf16>, vector<24x48xf32> -> vector<24x48xf32>
    %c1_37 = arith.constant 1 : index
    %c0_38 = arith.constant 0 : index
    %c0_39 = arith.constant 0 : index
    %40 = vector.load %arg4[%c1_37, %c0_38, %c0_39] : memref<2x96x48xbf16, #tpu.memory_space<vmem>>, vector<1x96x48xbf16>
    %41 = vector.shape_cast %40 : vector<1x96x48xbf16> to vector<96x48xbf16>
    %cst_40 = arith.constant dense<0.000000e+00> : vector<24x48xf32>
    %42 = tpu.matmul %36, %41, %cst_40 {dimension_numbers = #tpu.dot_dimension_numbers<[1], [0], [0], [1], [0, 0, 1, 1], [], []>} : vector<24x96xbf16>, vector<96x48xbf16>, vector<24x48xf32> -> vector<24x48xf32>
    %43 = arith.maximumf %39, %42 : vector<24x48xf32>
    %44 = arith.truncf %43 : vector<24x48xf32> to vector<24x48xbf16>
    %c0_41 = arith.constant 0 : index
    %c0_42 = arith.constant 0 : index
    %c0_43 = arith.constant 0 : index
    %45 = vector.load %arg5[%c0_41, %c0_42, %c0_43] : memref<2x12x24xbf16, #tpu.memory_space<vmem>>, vector<1x12x24xbf16>
    %46 = vector.shape_cast %45 : vector<1x12x24xbf16> to vector<12x24xbf16>
    %cst_44 = arith.constant dense<0.000000e+00> : vector<12x48xf32>
    %47 = tpu.matmul %46, %44, %cst_44 {dimension_numbers = #tpu.dot_dimension_numbers<[1], [0], [0], [1], [0, 0, 1, 1], [], []>} : vector<12x24xbf16>, vector<24x48xbf16>, vector<12x48xf32> -> vector<12x48xf32>
    %c1_45 = arith.constant 1 : index
    %c0_46 = arith.constant 0 : index
    %c0_47 = arith.constant 0 : index
    %48 = vector.load %arg5[%c1_45, %c0_46, %c0_47] : memref<2x12x24xbf16, #tpu.memory_space<vmem>>, vector<1x12x24xbf16>
    %49 = vector.shape_cast %48 : vector<1x12x24xbf16> to vector<12x24xbf16>
    %cst_48 = arith.constant dense<0.000000e+00> : vector<12x48xf32>
    %50 = tpu.matmul %49, %44, %cst_48 {dimension_numbers = #tpu.dot_dimension_numbers<[1], [0], [0], [1], [0, 0, 1, 1], [], []>} : vector<12x24xbf16>, vector<24x48xbf16>, vector<12x48xf32> -> vector<12x48xf32>
    %51 = arith.maximumf %47, %50 : vector<12x48xf32>
    %c0_49 = arith.constant 0 : index
    %c0_50 = arith.constant 0 : index
    %52 = vector.load %arg15[%c0_49, %c0_50] : memref<12x48xf32, #tpu.memory_space<vmem>>, vector<12x48xf32>
    tpu.vector_store %arg15[%c0_49, %c0_50], %51 {strides = array<i32>} : memref<12x48xf32, #tpu.memory_space<vmem>>, vector<12x48xf32>,
    %cst_51 = arith.constant 0.000000e+00 : f32
    %53 = vector.broadcast %cst_51 : f32 to vector<8x80xf32>
    %c0_52 = arith.constant 0 : index
    %c0_53 = arith.constant 0 : index
    %54 = vector.load %arg15[%c0_52, %c0_53] : memref<12x48xf32, #tpu.memory_space<vmem>>, vector<8x48xf32>
    %55 = arith.truncf %54 : vector<8x48xf32> to vector<8x48xbf16>
    %c0_54 = arith.constant 0 : index
    %c0_55 = arith.constant 0 : index
    %c0_56 = arith.constant 0 : index
    %56 = vector.load %arg6[%c0_54, %c0_55, %c0_56] : memref<5x48x80xbf16, #tpu.memory_space<vmem>>, vector<1x48x80xbf16>
    %57 = vector.shape_cast %56 : vector<1x48x80xbf16> to vector<48x80xbf16>
    %cst_57 = arith.constant dense<0.000000e+00> : vector<8x80xf32>
    %58 = tpu.matmul %55, %57, %cst_57 {dimension_numbers = #tpu.dot_dimension_numbers<[1], [0], [0], [1], [0, 0, 1, 1], [], []>} : vector<8x48xbf16>, vector<48x80xbf16>, vector<8x80xf32> -> vector<8x80xf32>
    %59 = arith.addf %53, %58 : vector<8x80xf32>
    %c1_58 = arith.constant 1 : index
    %c0_59 = arith.constant 0 : index
    %60 = vector.load %arg15[%c1_58, %c0_59] : memref<12x48xf32, #tpu.memory_space<vmem>>, vector<8x48xf32>
    %61 = arith.truncf %60 : vector<8x48xf32> to vector<8x48xbf16>
    %c1_60 = arith.constant 1 : index
    %c0_61 = arith.constant 0 : index
    %c0_62 = arith.constant 0 : index
    %62 = vector.load %arg6[%c1_60, %c0_61, %c0_62] : memref<5x48x80xbf16, #tpu.memory_space<vmem>>, vector<1x48x80xbf16>
    %63 = vector.shape_cast %62 : vector<1x48x80xbf16> to vector<48x80xbf16>
    %cst_63 = arith.constant dense<0.000000e+00> : vector<8x80xf32>
    %64 = tpu.matmul %61, %63, %cst_63 {dimension_numbers = #tpu.dot_dimension_numbers<[1], [0], [0], [1], [0, 0, 1, 1], [], []>} : vector<8x48xbf16>, vector<48x80xbf16>, vector<8x80xf32> -> vector<8x80xf32>
    %65 = arith.addf %59, %64 : vector<8x80xf32>
    %c2_64 = arith.constant 2 : index
    %c0_65 = arith.constant 0 : index
    %66 = vector.load %arg15[%c2_64, %c0_65] : memref<12x48xf32, #tpu.memory_space<vmem>>, vector<8x48xf32>
    %67 = arith.truncf %66 : vector<8x48xf32> to vector<8x48xbf16>
    %c2_66 = arith.constant 2 : index
    %c0_67 = arith.constant 0 : index
    %c0_68 = arith.constant 0 : index
    %68 = vector.load %arg6[%c2_66, %c0_67, %c0_68] : memref<5x48x80xbf16, #tpu.memory_space<vmem>>, vector<1x48x80xbf16>
    %69 = vector.shape_cast %68 : vector<1x48x80xbf16> to vector<48x80xbf16>
    %cst_69 = arith.constant dense<0.000000e+00> : vector<8x80xf32>
    %70 = tpu.matmul %67, %69, %cst_69 {dimension_numbers = #tpu.dot_dimension_numbers<[1], [0], [0], [1], [0, 0, 1, 1], [], []>} : vector<8x48xbf16>, vector<48x80xbf16>, vector<8x80xf32> -> vector<8x80xf32>
    %71 = arith.addf %65, %70 : vector<8x80xf32>
    %c3_70 = arith.constant 3 : index
    %c0_71 = arith.constant 0 : index
    %72 = vector.load %arg15[%c3_70, %c0_71] : memref<12x48xf32, #tpu.memory_space<vmem>>, vector<8x48xf32>
    %73 = arith.truncf %72 : vector<8x48xf32> to vector<8x48xbf16>
    %c3_72 = arith.constant 3 : index
    %c0_73 = arith.constant 0 : index
    %c0_74 = arith.constant 0 : index
    %74 = vector.load %arg6[%c3_72, %c0_73, %c0_74] : memref<5x48x80xbf16, #tpu.memory_space<vmem>>, vector<1x48x80xbf16>
    %75 = vector.shape_cast %74 : vector<1x48x80xbf16> to vector<48x80xbf16>
    %cst_75 = arith.constant dense<0.000000e+00> : vector<8x80xf32>
    %76 = tpu.matmul %73, %75, %cst_75 {dimension_numbers = #tpu.dot_dimension_numbers<[1], [0], [0], [1], [0, 0, 1, 1], [], []>} : vector<8x48xbf16>, vector<48x80xbf16>, vector<8x80xf32> -> vector<8x80xf32>
    %77 = arith.addf %71, %76 : vector<8x80xf32>
    %c4_76 = arith.constant 4 : index
    %c0_77 = arith.constant 0 : index
    %78 = vector.load %arg15[%c4_76, %c0_77] : memref<12x48xf32, #tpu.memory_space<vmem>>, vector<8x48xf32>
    %79 = arith.truncf %78 : vector<8x48xf32> to vector<8x48xbf16>
    %c4_78 = arith.constant 4 : index
    %c0_79 = arith.constant 0 : index
    %c0_80 = arith.constant 0 : index
    %80 = vector.load %arg6[%c4_78, %c0_79, %c0_80] : memref<5x48x80xbf16, #tpu.memory_space<vmem>>, vector<1x48x80xbf16>
    %81 = vector.shape_cast %80 : vector<1x48x80xbf16> to vector<48x80xbf16>
    %cst_81 = arith.constant dense<0.000000e+00> : vector<8x80xf32>
    %82 = tpu.matmul %79, %81, %cst_81 {dimension_numbers = #tpu.dot_dimension_numbers<[1], [0], [0], [1], [0, 0, 1, 1], [], []>} : vector<8x48xbf16>, vector<48x80xbf16>, vector<8x80xf32> -> vector<8x80xf32>
    %83 = arith.addf %77, %82 : vector<8x80xf32>
    %c0_82 = arith.constant 0 : index
    %c0_83 = arith.constant 0 : index
    %84 = vector.load %arg7[%c0_82, %c0_83] : memref<1x80xf32, #tpu.memory_space<vmem>>, vector<1x80xf32>
    %85 = vector.broadcast %84 : vector<1x80xf32> to vector<8x80xf32>
    %86 = arith.addf %83, %85 : vector<8x80xf32>
    %cst_84 = arith.constant 0.000000e+00 : f32
    %87 = vector.broadcast %cst_84 : f32 to vector<8x80xf32>
    %88 = arith.maximumf %86, %87 : vector<8x80xf32>
    %89 = arith.truncf %88 : vector<8x80xf32> to vector<8x80xbf16>
    %c0_85 = arith.constant 0 : index
    %c0_86 = arith.constant 0 : index
    %90 = vector.load %arg9[%c0_85, %c0_86] : memref<1x150xf32, #tpu.memory_space<vmem>>, vector<1x150xf32>
    %91 = vector.extract_strided_slice %89 {offsets = [0, 0], sizes = [1, 80], strides = [1, 1]} : vector<8x80xbf16> to vector<1x80xbf16>
    %c0_87 = arith.constant 0 : index
    %c0_88 = arith.constant 0 : index
    %c0_89 = arith.constant 0 : index
    %92 = vector.load %arg8[%c0_87, %c0_88, %c0_89] : memref<8x80x150xbf16, #tpu.memory_space<vmem>>, vector<1x80x150xbf16>
    %93 = vector.shape_cast %92 : vector<1x80x150xbf16> to vector<80x150xbf16>
    %cst_90 = arith.constant dense<0.000000e+00> : vector<1x150xf32>
    %94 = tpu.matmul %91, %93, %cst_90 {dimension_numbers = #tpu.dot_dimension_numbers<[1], [0], [0], [1], [0, 0, 1, 1], [], []>} : vector<1x80xbf16>, vector<80x150xbf16>, vector<1x150xf32> -> vector<1x150xf32>
    %95 = arith.addf %90, %94 : vector<1x150xf32>
    %96 = vector.extract_strided_slice %89 {offsets = [1, 0], sizes = [1, 80], strides = [1, 1]} : vector<8x80xbf16> to vector<1x80xbf16>
    %c1_91 = arith.constant 1 : index
    %c0_92 = arith.constant 0 : index
    %c0_93 = arith.constant 0 : index
    %97 = vector.load %arg8[%c1_91, %c0_92, %c0_93] : memref<8x80x150xbf16, #tpu.memory_space<vmem>>, vector<1x80x150xbf16>
    %98 = vector.shape_cast %97 : vector<1x80x150xbf16> to vector<80x150xbf16>
    %cst_94 = arith.constant dense<0.000000e+00> : vector<1x150xf32>
    %99 = tpu.matmul %96, %98, %cst_94 {dimension_numbers = #tpu.dot_dimension_numbers<[1], [0], [0], [1], [0, 0, 1, 1], [], []>} : vector<1x80xbf16>, vector<80x150xbf16>, vector<1x150xf32> -> vector<1x150xf32>
    %100 = arith.addf %95, %99 : vector<1x150xf32>
    %101 = vector.extract_strided_slice %89 {offsets = [2, 0], sizes = [1, 80], strides = [1, 1]} : vector<8x80xbf16> to vector<1x80xbf16>
    %c2_95 = arith.constant 2 : index
    %c0_96 = arith.constant 0 : index
    %c0_97 = arith.constant 0 : index
    %102 = vector.load %arg8[%c2_95, %c0_96, %c0_97] : memref<8x80x150xbf16, #tpu.memory_space<vmem>>, vector<1x80x150xbf16>
    %103 = vector.shape_cast %102 : vector<1x80x150xbf16> to vector<80x150xbf16>
    %cst_98 = arith.constant dense<0.000000e+00> : vector<1x150xf32>
    %104 = tpu.matmul %101, %103, %cst_98 {dimension_numbers = #tpu.dot_dimension_numbers<[1], [0], [0], [1], [0, 0, 1, 1], [], []>} : vector<1x80xbf16>, vector<80x150xbf16>, vector<1x150xf32> -> vector<1x150xf32>
    %105 = arith.addf %100, %104 : vector<1x150xf32>
    %106 = vector.extract_strided_slice %89 {offsets = [3, 0], sizes = [1, 80], strides = [1, 1]} : vector<8x80xbf16> to vector<1x80xbf16>
    %c3_99 = arith.constant 3 : index
    %c0_100 = arith.constant 0 : index
    %c0_101 = arith.constant 0 : index
    %107 = vector.load %arg8[%c3_99, %c0_100, %c0_101] : memref<8x80x150xbf16, #tpu.memory_space<vmem>>, vector<1x80x150xbf16>
    %108 = vector.shape_cast %107 : vector<1x80x150xbf16> to vector<80x150xbf16>
    %cst_102 = arith.constant dense<0.000000e+00> : vector<1x150xf32>
    %109 = tpu.matmul %106, %108, %cst_102 {dimension_numbers = #tpu.dot_dimension_numbers<[1], [0], [0], [1], [0, 0, 1, 1], [], []>} : vector<1x80xbf16>, vector<80x150xbf16>, vector<1x150xf32> -> vector<1x150xf32>
    %110 = arith.addf %105, %109 : vector<1x150xf32>
    %111 = vector.extract_strided_slice %89 {offsets = [4, 0], sizes = [1, 80], strides = [1, 1]} : vector<8x80xbf16> to vector<1x80xbf16>
    %c4_103 = arith.constant 4 : index
    %c0_104 = arith.constant 0 : index
    %c0_105 = arith.constant 0 : index
    %112 = vector.load %arg8[%c4_103, %c0_104, %c0_105] : memref<8x80x150xbf16, #tpu.memory_space<vmem>>, vector<1x80x150xbf16>
    %113 = vector.shape_cast %112 : vector<1x80x150xbf16> to vector<80x150xbf16>
    %cst_106 = arith.constant dense<0.000000e+00> : vector<1x150xf32>
    %114 = tpu.matmul %111, %113, %cst_106 {dimension_numbers = #tpu.dot_dimension_numbers<[1], [0], [0], [1], [0, 0, 1, 1], [], []>} : vector<1x80xbf16>, vector<80x150xbf16>, vector<1x150xf32> -> vector<1x150xf32>
    %115 = arith.addf %110, %114 : vector<1x150xf32>
    %116 = vector.extract_strided_slice %89 {offsets = [5, 0], sizes = [1, 80], strides = [1, 1]} : vector<8x80xbf16> to vector<1x80xbf16>
    %c5 = arith.constant 5 : index
    %c0_107 = arith.constant 0 : index
    %c0_108 = arith.constant 0 : index
    %117 = vector.load %arg8[%c5, %c0_107, %c0_108] : memref<8x80x150xbf16, #tpu.memory_space<vmem>>, vector<1x80x150xbf16>
    %118 = vector.shape_cast %117 : vector<1x80x150xbf16> to vector<80x150xbf16>
    %cst_109 = arith.constant dense<0.000000e+00> : vector<1x150xf32>
    %119 = tpu.matmul %116, %118, %cst_109 {dimension_numbers = #tpu.dot_dimension_numbers<[1], [0], [0], [1], [0, 0, 1, 1], [], []>} : vector<1x80xbf16>, vector<80x150xbf16>, vector<1x150xf32> -> vector<1x150xf32>
    %120 = arith.addf %115, %119 : vector<1x150xf32>
    %121 = vector.extract_strided_slice %89 {offsets = [6, 0], sizes = [1, 80], strides = [1, 1]} : vector<8x80xbf16> to vector<1x80xbf16>
    %c6 = arith.constant 6 : index
    %c0_110 = arith.constant 0 : index
    %c0_111 = arith.constant 0 : index
    %122 = vector.load %arg8[%c6, %c0_110, %c0_111] : memref<8x80x150xbf16, #tpu.memory_space<vmem>>, vector<1x80x150xbf16>
    %123 = vector.shape_cast %122 : vector<1x80x150xbf16> to vector<80x150xbf16>
    %cst_112 = arith.constant dense<0.000000e+00> : vector<1x150xf32>
    %124 = tpu.matmul %121, %123, %cst_112 {dimension_numbers = #tpu.dot_dimension_numbers<[1], [0], [0], [1], [0, 0, 1, 1], [], []>} : vector<1x80xbf16>, vector<80x150xbf16>, vector<1x150xf32> -> vector<1x150xf32>
    %125 = arith.addf %120, %124 : vector<1x150xf32>
    %126 = vector.extract_strided_slice %89 {offsets = [7, 0], sizes = [1, 80], strides = [1, 1]} : vector<8x80xbf16> to vector<1x80xbf16>
    %c7 = arith.constant 7 : index
    %c0_113 = arith.constant 0 : index
    %c0_114 = arith.constant 0 : index
    %127 = vector.load %arg8[%c7, %c0_113, %c0_114] : memref<8x80x150xbf16, #tpu.memory_space<vmem>>, vector<1x80x150xbf16>
    %128 = vector.shape_cast %127 : vector<1x80x150xbf16> to vector<80x150xbf16>
    %cst_115 = arith.constant dense<0.000000e+00> : vector<1x150xf32>
    %129 = tpu.matmul %126, %128, %cst_115 {dimension_numbers = #tpu.dot_dimension_numbers<[1], [0], [0], [1], [0, 0, 1, 1], [], []>} : vector<1x80xbf16>, vector<80x150xbf16>, vector<1x150xf32> -> vector<1x150xf32>
    %130 = arith.addf %125, %129 : vector<1x150xf32>
    %cst_116 = arith.constant 0.000000e+00 : f32
    %131 = vector.broadcast %cst_116 : f32 to vector<1x150xf32>
    %132 = arith.maximumf %130, %131 : vector<1x150xf32>
    %133 = arith.truncf %132 : vector<1x150xf32> to vector<1x150xbf16>
    %c0_117 = arith.constant 0 : index
    %c0_118 = arith.constant 0 : index
    %134 = vector.load %arg10[%c0_117, %c0_118] : memref<150x80xbf16, #tpu.memory_space<vmem>>, vector<150x80xbf16>
    %cst_119 = arith.constant dense<0.000000e+00> : vector<1x80xf32>
    %135 = tpu.matmul %133, %134, %cst_119 {dimension_numbers = #tpu.dot_dimension_numbers<[1], [0], [0], [1], [0, 0, 1, 1], [], []>} : vector<1x150xbf16>, vector<150x80xbf16>, vector<1x80xf32> -> vector<1x80xf32>
    %c0_120 = arith.constant 0 : index
    %c0_121 = arith.constant 0 : index
    %136 = vector.load %arg11[%c0_120, %c0_121] : memref<1x80xf32, #tpu.memory_space<vmem>>, vector<1x80xf32>
    %137 = arith.addf %135, %136 : vector<1x80xf32>
    %cst_122 = arith.constant 0.000000e+00 : f32
    %138 = vector.broadcast %cst_122 : f32 to vector<1x80xf32>
    %139 = arith.maximumf %137, %138 : vector<1x80xf32>
    %140 = arith.truncf %139 : vector<1x80xf32> to vector<1x80xbf16>
    %c0_123 = arith.constant 0 : index
    %c0_124 = arith.constant 0 : index
    %141 = vector.load %arg12[%c0_123, %c0_124] : memref<80x10xbf16, #tpu.memory_space<vmem>>, vector<80x10xbf16>
    %cst_125 = arith.constant dense<0.000000e+00> : vector<1x10xf32>
    %142 = tpu.matmul %140, %141, %cst_125 {dimension_numbers = #tpu.dot_dimension_numbers<[1], [0], [0], [1], [0, 0, 1, 1], [], []>} : vector<1x80xbf16>, vector<80x10xbf16>, vector<1x10xf32> -> vector<1x10xf32>
    %c0_126 = arith.constant 0 : index
    %c0_127 = arith.constant 0 : index
    %143 = vector.load %arg13[%c0_126, %c0_127] : memref<1x10xf32, #tpu.memory_space<vmem>>, vector<1x10xf32>
    %144 = arith.addf %142, %143 : vector<1x10xf32>
    %145 = vector.shape_cast %144 : vector<1x10xf32> to vector<1x1x10xf32>
    %c0_128 = arith.constant 0 : index
    %c0_129 = arith.constant 0 : index
    %c0_130 = arith.constant 0 : index
    %146 = vector.load %arg14[%c0_128, %c0_129, %c0_130] : memref<1x1x10xf32, #tpu.memory_space<vmem>>, vector<1x1x10xf32>
    tpu.vector_store %arg14[%c0_128, %c0_129, %c0_130], %145 {strides = array<i32>} : memref<1x1x10xf32, #tpu.memory_space<vmem>>, vector<1x1x10xf32>,
    return
  }
  func.func @transform_0(%arg0: i32) -> (i32, i32, i32) {
    %c0_i32 = arith.constant 0 : i32
    %c0_i32_0 = arith.constant 0 : i32
    %c0_i32_1 = arith.constant 0 : i32
    return %arg0, %c0_i32, %c0_i32_0 : i32, i32, i32
  }
  func.func @transform_1(%arg0: i32) -> (i32, i32, i32) {
    %c0_i32 = arith.constant 0 : i32
    %c0_i32_0 = arith.constant 0 : i32
    %c0_i32_1 = arith.constant 0 : i32
    %c0_i32_2 = arith.constant 0 : i32
    return %c0_i32, %c0_i32_0, %c0_i32_1 : i32, i32, i32
  }
  func.func @transform_2(%arg0: i32) -> (i32, i32) {
    %c0_i32 = arith.constant 0 : i32
    %c0_i32_0 = arith.constant 0 : i32
    %c0_i32_1 = arith.constant 0 : i32
    return %c0_i32, %c0_i32_0 : i32, i32
  }
  func.func @transform_3(%arg0: i32) -> (i32, i32, i32) {
    %c0_i32 = arith.constant 0 : i32
    %c0_i32_0 = arith.constant 0 : i32
    %c0_i32_1 = arith.constant 0 : i32
    %c0_i32_2 = arith.constant 0 : i32
    return %c0_i32, %c0_i32_0, %c0_i32_1 : i32, i32, i32
  }
  func.func @transform_4(%arg0: i32) -> (i32, i32, i32) {
    %c0_i32 = arith.constant 0 : i32
    %c0_i32_0 = arith.constant 0 : i32
    %c0_i32_1 = arith.constant 0 : i32
    %c0_i32_2 = arith.constant 0 : i32
    return %c0_i32, %c0_i32_0, %c0_i32_1 : i32, i32, i32
  }
  func.func @transform_5(%arg0: i32) -> (i32, i32, i32) {
    %c0_i32 = arith.constant 0 : i32
    %c0_i32_0 = arith.constant 0 : i32
    %c0_i32_1 = arith.constant 0 : i32
    %c0_i32_2 = arith.constant 0 : i32
    return %c0_i32, %c0_i32_0, %c0_i32_1 : i32, i32, i32
  }
  func.func @transform_6(%arg0: i32) -> (i32, i32) {
    %c0_i32 = arith.constant 0 : i32
    %c0_i32_0 = arith.constant 0 : i32
    %c0_i32_1 = arith.constant 0 : i32
    return %c0_i32, %c0_i32_0 : i32, i32
  }
  func.func @transform_7(%arg0: i32) -> (i32, i32, i32) {
    %c0_i32 = arith.constant 0 : i32
    %c0_i32_0 = arith.constant 0 : i32
    %c0_i32_1 = arith.constant 0 : i32
    %c0_i32_2 = arith.constant 0 : i32
    return %c0_i32, %c0_i32_0, %c0_i32_1 : i32, i32, i32
  }
  func.func @transform_8(%arg0: i32) -> (i32, i32) {
    %c0_i32 = arith.constant 0 : i32
    %c0_i32_0 = arith.constant 0 : i32
    %c0_i32_1 = arith.constant 0 : i32
    return %c0_i32, %c0_i32_0 : i32, i32
  }
  func.func @transform_9(%arg0: i32) -> (i32, i32) {
    %c0_i32 = arith.constant 0 : i32
    %c0_i32_0 = arith.constant 0 : i32
    %c0_i32_1 = arith.constant 0 : i32
    return %c0_i32, %c0_i32_0 : i32, i32
  }
  func.func @transform_10(%arg0: i32) -> (i32, i32) {
    %c0_i32 = arith.constant 0 : i32
    %c0_i32_0 = arith.constant 0 : i32
    %c0_i32_1 = arith.constant 0 : i32
    return %c0_i32, %c0_i32_0 : i32, i32
  }
  func.func @transform_11(%arg0: i32) -> (i32, i32) {
    %c0_i32 = arith.constant 0 : i32
    %c0_i32_0 = arith.constant 0 : i32
    %c0_i32_1 = arith.constant 0 : i32
    return %c0_i32, %c0_i32_0 : i32, i32
  }
  func.func @transform_12(%arg0: i32) -> (i32, i32) {
    %c0_i32 = arith.constant 0 : i32
    %c0_i32_0 = arith.constant 0 : i32
    %c0_i32_1 = arith.constant 0 : i32
    return %c0_i32, %c0_i32_0 : i32, i32
  }
  func.func @transform_13(%arg0: i32) -> (i32, i32, i32) {
    %c0_i32 = arith.constant 0 : i32
    %c0_i32_0 = arith.constant 0 : i32
    %c0_i32_1 = arith.constant 0 : i32
    return %arg0, %c0_i32, %c0_i32_0 : i32, i32, i32
  }
}

</mosaic_0001>

<bundles_post_ra>
// kernel: net_forward.1
= control target key start
LH: loop header
LB: loop body
LE: loop exit
PB: predicated region body
PF: predicated region fallthrough
CT: control target
= control target key end

     0   :  { %s4746_s0 = inlined_call_operand.vmem [shape: bf16[2,28,84], index: 0, kind: input, shape index: {}]   ;;  %s4747_s1 = inlined_call_operand.vmem [shape: bf16[5,84,96], index: 1, kind: input, shape index: {}]   ;;  %s4748_s2 = inlined_call_operand.vmem [shape: f32[1,96], index: 2, kind: input, shape index: {}]   ;;  %s4749_s3 = inlined_call_operand.vmem [shape: bf16[2,96,48], index: 3, kind: input, shape index: {}]   ;;  %s4750_s4 = inlined_call_operand.vmem [shape: bf16[2,12,24], index: 4, kind: input, shape index: {}]   ;;  %s4751_s5 = inlined_call_operand.vmem [shape: bf16[5,48,80], index: 5, kind: input, shape index: {}]   ;;  %s4752_s6 = inlined_call_operand.vmem [shape: f32[1,80], index: 6, kind: input, shape index: {}]   ;;  %s4753_s7 = inlined_call_operand.vmem [shape: bf16[8,80,150], index: 7, kind: input, shape index: {}]   ;;  %s4754_s8 = inlined_call_operand.vmem [shape: f32[1,150], index: 8, kind: input, shape index: {}]   ;;  %s4755_s9 = inlined_call_operand.vmem [shape: bf16[150,80], index: 9, kind: input, shape index: {}]   ;;  %s4756_s10 = inlined_call_operand.vmem [shape: f32[1,80], index: 10, kind: input, shape index: {}]   ;;  %s4757_s11 = inlined_call_operand.vmem [shape: bf16[80,10], index: 11, kind: input, shape index: {}]   ;;  %s4758_s12 = inlined_call_operand.vmem [shape: f32[1,10], index: 12, kind: input, shape index: {}]   ;;  %s4759_s13 = inlined_call_operand.hbm [shape: f32[2,1,10], index: 13, kind: output, shape index: {}]  }
   0x1   :  { %4761 = sst [smem:[#allocation8_spill]] %s4746_s0 }
   0x2   :  { %18 = vsyncpa [#allocation4], 0 }
   0x3   :  { %20 = vsyncpa [#allocation4 + $0x1], 0  ;;  %s4040_s25 = smov 0   ;;  %s4042_s26 = smov 0  }
   0x4   :  { %s4044_s27 = smov 0   ;;  %s4046_s28 = smov 0  }
   0x5 LB: > { %4762 = sst [smem:[#allocation6_spill]] %s3959_s27  ;;  %s4061_s29 = sadd.s32 4294967295, %s3963_s28   ;;  %s3963_s28 = sphi %s4046_s28, %s4771_s28   ;;  %s3959_s27 = sphi %s4044_s27, %s4768_s27   ;;  %s3955_s26 = sphi %s4042_s26, %s4770_s26   ;;  %s3951_s25 = sphi %s4040_s25, %s4769_s25  }
   0x6   : > { %s3020_s30 = sadd.s32 4294967294, %s3963_s28   ;;  %s4065_s14 = sadd.s32 1, %s3963_s28  }
   0x7   : > { %s311_s15 = sadd.s32 1, %s3959_s27  ;;  %s308_s16 = ssub.s32 %s3963_s28, %s4065_s14 }
   0x8   : > { %p321_p0 = scmp.ne.s32.totalorder %s3959_s27, %s3955_s26  ;;  %p309_p1 = scmp.eq.s32.totalorder %s308_s16, 0 }
   0x9   : > { %p322_p2 = scmp.eq.s32.totalorder %s4061_s29, 1  ;;  %p327_p3 = scmp.ne.s32.totalorder %s3955_s26, %s3951_s25 }
   0xa   : > { %p328_p4 = scmp.eq.s32.totalorder %s3020_s30, 1  ;;  %p3023_p7 = scmp.ge.s32.totalorder %s3963_s28, 1 }
   0xb   : > { %s4076_s17 = scalar_select %p309_p1, %s3959_s27, %s311_s15  }
   0xc   : > { %p4078_p5 = por %p322_p2, %p321_p0  ;;  %p4082_p6 = por %p328_p4, %p327_p3 }
   0xd   : > { %4763 = sst [smem:[#allocation7_spill]] %s4076_s17  ;;  %p390_p8 = scmp.lt.s32.totalorder %s3963_s28, 3 }
   0xf   : > { %p391_p9 = pnand %p3023_p7, %p390_p8 }
  0x10   : > { %p433_p10 = scmp.lt.s32.totalorder (!%p391_p9), %s4061_s29, 1  ;;  %s4766_s0 = sld [smem:[#allocation8_spill]] (!%p391_p9) }
  0x11   : > { %394 = sbr.rel (%p391_p9) target bundleno = 1643 (0x66b), region = 72  ;;  %s3371_s15 = sshll.u32 (!%p391_p9), %s4061_s29, 4 }
  0x12   : > { %s4705_s30 = scalar_lea.hbm (!%p391_p9), %s4759_s13, %s3371_s15  ;;  %s3969_s17 = smov (!%p391_p9), [#allocation3]  }
  0x16   : > { %v3703_v0 = vld [vmem:[%s4747_s1 + $0x54] ss:$0 sps:$4 sm:$0x33]   ;;  %vm532_vm0 = vcmask 1041408   ;;  %v3705_v2 = vld [vmem:[%s4747_s1 + $0x4c] sm:$0xff]   ;;  %v3706_v4 = vld [vmem:[%s4747_s1 + $0x20] sm:$0xff]  }
  0x17   : > { %v3704_v1 = vld [vmem:[%s4747_s1 + $0x28] ss:$0 sps:$4 sm:$0x33]   ;;  %3655 = vmatprep.subr.msk.bf16.mxu0 %vm532_vm0, %v3703_v0  ;;  %v534_v3 = vsel %vm532_vm0, %v3703_v0, 0  ;;  %v3708_v7 = vld [vmem:[%s4747_s1 + $0x18] sm:$0xff]   ;;  %s434_s24 = scalar_select %p433_p10, %s4061_s29, 1 }
  0x18   : > { %3656 = vmatprep.subr.msk.bf16.mxu1 %vm532_vm0, %v3704_v1  ;;  %3464 = vmatpush3.bf16.msra.mxu0 %v534_v3  ;;  %v624_v5 = vsel %vm532_vm0, %v3704_v1, 0  ;;  %v3707_v6 = vld [vmem:[%s4747_s1 + $0x44] sm:$0xff]   ;;  %v3709_v8 = vld [vmem:[%s4747_s1 + $0x3c] sm:$0xff]   ;;  %v3710_v9 = vld [vmem:[%s4747_s1 + $0x10] sm:$0xff]   ;;  %vm525_vm1 = vcmask 687104   ;;  %vm690_vm3 = vcmask 1046528  }
  0x19   : > { %3480 = vmatpush3.bf16.msra.mxu1 %v624_v5  ;;  %3465 = vmatprep.subr.bf16.mxu0 %v3705_v2  ;;  %s3374_s21 = sshll.u32 %s434_s24, 4  ;;  %v3711_v10 = vld [vmem:[%s4747_s1 + $0x34] sm:$0xff]   ;;  %v3712_v15 = vld [vmem:[%s4747_s1 + $0x8] sm:$0xff]   ;;  %v3714_v23 = vld [vmem:[%s4747_s1] sm:$0xff]   ;;  %vm476_vm2 = vsmask.f32 7424 }
  0x1a   : > { %3481 = vmatprep.subr.bf16.mxu1 %v3706_v4  ;;  %s4121_s22 = scalar_lea.vmem %s4766_s0, %s3374_s21  ;;  %v3713_v22 = vld [vmem:[%s4747_s1 + $0x2c] sm:$0xff]   ;;  %v3719_v28 = vld [vmem:[%s4747_s1 + $0x80] ss:$0 sps:$4 sm:$0x33]   ;;  %v3721_v37 = vld [vmem:[%s4747_s1 + $0x78] sm:$0xff]   ;;  %vm930_vm5 = vcmask 1045504  }
  0x1b   : > { %v439_v11 = vld [vmem:[%s4121_s22] sm:$0xf]  ;;  %v4128_v12 = vld [vmem:[%s4121_s22 + $0x4] sm:$0xf]  ;;  %v441_v13 = vld [vmem:[%s4121_s22 + $0x8] sm:$0xf] }
  0x1c   : > { %3466 = vmatpush3.bf16.msra.mxu0 %v3705_v2  ;;  %v453_v14 = vld [vmem:[%s4121_s22 + $0xc] sm:$0x1]  ;;  %v3037_v16 = vcombine.low %v439_v11, %v4128_v12  ;;  %v3047_v35 = vcombine.low %v441_v13, %v441_v13  ;;  %v734_v36 = vsel %vm532_vm0, %v3719_v28, 0  ;;  %v3722_v39 = vld [vmem:[%s4747_s1 + $0xa4] sm:$0xff]   ;;  %v674_v40 = vld [vmem:[%s4121_s22] sm:$0xe] }
  0x1d   : > { %3482 = vmatpush3.bf16.msra.mxu1 %v3706_v4  ;;  %3467 = vmatprep.subr.bf16.mxu0 %v3707_v6  ;;  %v4136_v17 = vcombine.low %v441_v13, %v453_v14  ;;  %v787_v18 = vld [vmem:[%s4121_s22 + $0xc] sm:$0x3]  ;;  %v3723_v43 = vld [vmem:[%s4747_s1 + $0x70] sm:$0xff]   ;;  %v3067_v44 = vcombine.low %v674_v40, %v4128_v12  ;;  %v3732_v46 = vld [vmem:[%s4747_s1 + $0xd8] ss:$0 sps:$4 sm:$0x33]  }
  0x1e   : > { %3483 = vmatprep.subr.bf16.mxu1 %v3708_v7  ;;  %v478_v19 = vshrl.u32 %v3037_v16, 16  ;;  %v480_v20 = vshll.u32 %v3037_v16, 16  ;;  %3491 = vmatprep.mubr.msk.bf16.mxu1 %vm525_vm1, %v3037_v16  ;;  %v4148_v27 = vcombine.low %v441_v13, %v787_v18  ;;  %v3720_v30 = vld [vmem:[%s4747_s1 + $0xac] ss:$0 sps:$4 sm:$0x33]   ;;  %v3724_v47 = vld [vmem:[%s4747_s1 + $0x9c] sm:$0xff]  }
  0x1f   : > { %v485_v21 = vshll.u32 %v4136_v17, 16  ;;  %v489_v26 = vshrl.u32 %v4136_v17, 16  ;;  %v861_v38 = vsel %vm532_vm0, %v3720_v30, 0  ;;  %v692_v45 = vrot.slane %v4136_v17, 1  ;;  %v3725_v51 = vld [vmem:[%s4747_s1 + $0x68] sm:$0xff]   ;;  %v3726_v53 = vld [vmem:[%s4747_s1 + $0x94] sm:$0xff]  }
  0x20   : > { %3468 = vmatpush3.bf16.msra.mxu0 %v3707_v6  ;;  %v482_v24 = vrot.slane %v480_v20, 1  ;;  %v813_v33 = vshrl.u32 %v4148_v27, 16  ;;  %v816_v34 = vshll.u32 %v4148_v27, 16  ;;  %v691_v48 = vrot.slane %v3067_v44, 1  ;;  %v914_v59 = vld [vmem:[%s4121_s22] sm:$0xc] }
  0x21   : > { %3484 = vmatpush3.bf16.msra.mxu1 %v3708_v7  ;;  %3469 = vmatprep.subr.bf16.mxu0 %v3709_v8  ;;  %v487_v25 = vrot.slane %v485_v21, 1  ;;  %v805_v49 = vshrl.u32 %v3067_v44, 16  ;;  %v808_v50 = vshll.u32 %v3067_v44, 16  ;;  %vm803_vm4 = vsmask.f32 6400  ;;  %v3727_v61 = vld [vmem:[%s4747_s1 + $0x60] sm:$0xff]  }
  0x22   : > { %3485 = vmatprep.subr.bf16.mxu1 %v3710_v9  ;;  %v483_v29 = vor.u32 %v482_v24, %v478_v19  ;;  %v815_v41 = vrot.slane %v813_v33, 1  ;;  %v818_v42 = vrot.slane %v816_v34, 2  ;;  %v693_v54 = vsel %vm690_vm3, %v691_v48, %v692_v45  ;;  %v3728_v63 = vld [vmem:[%s4747_s1 + $0x8c] sm:$0xff]   ;;  %v3729_v2 = vld [vmem:[%s4747_s1 + $0x58] sm:$0xff]   ;;  %v3730_v3 = vld [vmem:[%s4747_s1 + $0x84] sm:$0xff]   ;;  %s431_s22 = sand.u32 1, %s3955_s26  }
  0x23   : > { %v491_v32 = vor.u32 %v489_v26, %v487_v25  ;;  %v807_v55 = vrot.slane %v805_v49, 1  ;;  %v810_v56 = vrot.slane %v808_v50, 2  ;;  %v974_v58 = vsel %vm532_vm0, %v3732_v46, 0  ;;  %v3733_v4 = vld [vmem:[%s4747_s1 + $0xd0] sm:$0xff]   ;;  %v3734_v6 = vld [vmem:[%s4747_s1 + $0xc8] sm:$0xff]   ;;  %v3735_v7 = vld [vmem:[%s4747_s1 + $0xc0] sm:$0xff]  }
  0x24   : > { %3470 = vmatpush3.bf16.msra.mxu0 %v3709_v8  ;;  %v488_v31 = vsel %vm476_vm2, %v483_v29, %v487_v25  ;;  %v819_v52 = vor.u32 %v818_v42, %v815_v41  ;;  %v932_v60 = vrot.slane %v4148_v27, 2  ;;  %v3107_v62 = vcombine.low %v914_v59, %v4128_v12  ;;  %v3736_v8 = vld [vmem:[%s4747_s1 + $0xb8] sm:$0xff]   ;;  %v3741_v12 = vld [vmem:[%s4749_s3 + $0x20] sm:$0xff]   ;;  %v3742_v13 = vld [vmem:[%s4749_s3 + $0x50] sm:$0xff]   ;;  %s432_s16 = scalar_lea.vmem [#allocation3], %s431_s22  ;;  %s2953_s27 = scalar_lea.sflag [#allocation4], %s431_s22 }
  0x25   : > { %3486 = vmatpush3.bf16.msra.mxu1 %v3710_v9  ;;  %3471 = vmatprep.subr.bf16.mxu0 %v3711_v10  ;;  %v811_v57 = vor.u32 %v810_v56, %v807_v55  ;;  %v3737_v9 = vld [vmem:[%s4747_s1 + $0xb0] sm:$0xff]   ;;  %v3740_v11 = vld [vmem:[%s4749_s3 + $0x58] sm:$0xff]   ;;  %v3746_v17 = vld [vmem:[%s4749_s3 + $0x40] sm:$0xff]   ;;  %vm1090_vm6 = vcmask 785408   ;;  %vm3966_vm7 = vmmov 0   ;;  %vm1258_vm8 = vcmask 1043456  }
  0x26   : > { %3487 = vmatprep.subr.bf16.mxu1 %v3712_v15  ;;  %3475 = vmatprep.mubr.msk.bf16.mxu0 %vm525_vm1, %v488_v31  ;;  %v931_v1 = vrot.slane %v3107_v62, 2  ;;  %v3743_v14 = vld [vmem:[%s4749_s3 + $0x18] sm:$0xff]   ;;  %v3745_v16 = vld [vmem:[%s4749_s3 + $0x10] sm:$0xff]   ;;  %v3747_v18 = vld [vmem:[%s4749_s3 + $0x8] sm:$0xff]   ;;  %vm1254_vm9 = vcmask 195584   ;;  %vm1357_vm10 = vcmask 392192  }
  0x27   : > { %v820_v0 = vsel %vm803_vm4, %v811_v57, %v819_v52  ;;  %v3748_v19 = vld [vmem:[%s4749_s3 + $0x38] sm:$0xff]   ;;  %v3749_v20 = vld [vmem:[%s4749_s3] sm:$0xff]   ;;  %v3750_v21 = vld [vmem:[%s4749_s3 + $0x30] sm:$0xff]   ;;  %vm1359_vm11 = vcmask 388096   ;;  %vm1784_vm12 = vcmask 654336   ;;  %vm2820_vm13 = vcmask 1042432  }
  0x28   : > { %3472 = vmatpush3.bf16.msra.mxu0 %v3711_v10  ;;  %v933_v5 = vsel %vm930_vm5, %v931_v1, %v932_v60  ;;  %v3739_v10 = vld [vmem:[%s4749_s3 + $0x28] sm:$0xff]   ;;  %v3116_v49 = vld [vmem:[%s4748_s2] ss:$0 sm:$0xff]  ;;  %vm2816_vm14 = vcmask 179200   ;;  %s2965_s20 = sshll.u32 %s432_s16, 4  ;;  %vm2950_vm15 = vcmask 73728   ;;  %s4707_s20 = int_to_ptr.vmem [resolvable:$true] %s2965_s20 }
  0x29   : > { %3488 = vmatpush3.bf16.msra.mxu1 %v3712_v15  ;;  %3473 = vmatprep.subr.bf16.mxu0 %v3713_v22  ;;  %v3744_v15 = vld [vmem:[%s4749_s3 + $0x48] sm:$0xff]   ;;  %s3903_s29 = scalar_lea.vmem %s4707_s20, 16  ;;  %s3907_s24 = sshll.u32 %s3969_s17, 4  ;;  %s3908_s24 = int_to_ptr.vmem [resolvable:$false] %s3907_s24 }
  0x2a   : > { %3489 = vmatprep.subr.bf16.mxu1 %v3714_v23  ;;  %p3904_p11 = scmp.ne.s32.totalorder %s4707_s20, %s3903_s29  ;;  %s3909_s21 = scalar_lea.vmem %s3908_s24, 32 }
  0x2b   : > { %p3910_p0 = scmp.lt.s32.totalorder %s4707_s20, %s3908_s24  ;;  %p3911_p1 = scmp.lt.s32.totalorder %s3909_s21, %s3903_s29 }
  0x2c   : > { %3474 = vmatpush3.bf16.msra.mxu0 %v3713_v22  ;;  %p3905_p12 = pnand %p3904_p11, %p4078_p5 }
  0x2d   : > { %3490 = vmatpush3.bf16.msra.mxu1 %v3714_v23  ;;  %3657 = vmatprep.subr.msk.bf16.mxu0 %vm532_vm0, %v3719_v28  ;;  %p3912_p2 = por %p3911_p1, %p3910_p0 }
  0x2e   : > { %3658 = vmatprep.subr.msk.bf16.mxu1 %vm532_vm0, %v3720_v30  ;;  %p3906_p13 = pneg %p3905_p12 }
  0x2f   : > { %3476 = vmatmul.mubr.msk.bf16.vlgmr.msra.gmra.mxu0 %vm525_vm1, %v491_v32 }
  0x30   : > { %3492 = vmatmul.mubr.msk.bf16.vlgmr.msra.gmra.mxu1 %vm525_vm1, %v3047_v35  ;;  %3496 = vmatpush3.bf16.msra.mxu0 %v734_v36  ;;  %p3913_p3 = pnand %p3912_p2, %p3906_p13 }
  0x31   : > { %3512 = vmatpush3.bf16.msra.mxu1 %v861_v38  ;;  %3497 = vmatprep.subr.bf16.mxu0 %v3721_v37 }
  0x32   : > { %3513 = vmatprep.subr.bf16.mxu1 %v3722_v39  ;;  %3507 = vmatprep.mubr.msk.bf16.mxu0 %vm525_vm1, %v693_v54 }
  0x33   : > { %3523 = vmatprep.mubr.msk.bf16.mxu1 %vm525_vm1, %v820_v0 }
  0x34   : > { %3498 = vmatpush3.bf16.msra.mxu0 %v3721_v37 }
  0x35   : > { %3514 = vmatpush3.bf16.msra.mxu1 %v3722_v39  ;;  %3499 = vmatprep.subr.bf16.mxu0 %v3723_v43 }
  0x36   : > { %3515 = vmatprep.subr.bf16.mxu1 %v3724_v47 }
  0x38   : > { %3500 = vmatpush3.bf16.msra.mxu0 %v3723_v43 }
  0x39   : > { %3516 = vmatpush3.bf16.msra.mxu1 %v3724_v47  ;;  %3501 = vmatprep.subr.bf16.mxu0 %v3725_v51 }
  0x3a   : > { %3517 = vmatprep.subr.bf16.mxu1 %v3726_v53 }
  0x3c   : > { %3502 = vmatpush3.bf16.msra.mxu0 %v3725_v51 }
  0x3d   : > { %3518 = vmatpush3.bf16.msra.mxu1 %v3726_v53  ;;  %3503 = vmatprep.subr.bf16.mxu0 %v3727_v61 }
  0x3e   : > { %3519 = vmatprep.subr.bf16.mxu1 %v3728_v63 }
  0x40   : > { %3504 = vmatpush3.bf16.msra.mxu0 %v3727_v61 }
  0x41   : > { %3520 = vmatpush3.bf16.msra.mxu1 %v3728_v63  ;;  %3505 = vmatprep.subr.bf16.mxu0 %v3729_v2  ;;  %v3965_v63 = vmov 0.0  }
  0x42   : > { %3521 = vmatprep.subr.bf16.mxu1 %v3730_v3 }
  0x44   : > { %3506 = vmatpush3.bf16.msra.mxu0 %v3729_v2 }
  0x45   : > { %3522 = vmatpush3.bf16.msra.mxu1 %v3730_v3  ;;  %3659 = vmatprep.subr.msk.bf16.mxu0 %vm532_vm0, %v3732_v46 }
  0x46   : > { %3543 = vmatprep.subr.bf16.mxu1 %v3739_v10 }
  0x47   : > { %3508 = vmatmul.mubr.msk.bf16.vlgmr.msra.gmra.mxu0 %vm525_vm1, %v692_v45 }
  0x48   : > { %3528 = vmatpush3.bf16.msra.mxu0 %v974_v58  ;;  %3524 = vmatmul.mubr.msk.bf16.vlgmr.msra.gmra.mxu1 %vm525_vm1, %v819_v52 }
  0x49   : > { %3529 = vmatprep.subr.bf16.mxu0 %v3733_v4  ;;  %3539 = vmatprep.mubr.msk.bf16.mxu0 %vm525_vm1, %v933_v5 }
  0x4a   : > { %3544 = vmatpush3.bf16.msra.mxu1 %v3739_v10 }
  0x4b   : > { %3545 = vmatprep.subr.bf16.mxu1 %v3741_v12 }
  0x4c   : > { %3530 = vmatpush3.bf16.msra.mxu0 %v3733_v4 }
  0x4d   : > { %3531 = vmatprep.subr.bf16.mxu0 %v3734_v6 }
  0x4e   : > { %3546 = vmatpush3.bf16.msra.mxu1 %v3741_v12 }
  0x4f   : > { %3547 = vmatprep.subr.bf16.mxu1 %v3743_v14 }
  0x50   : > { %3532 = vmatpush3.bf16.msra.mxu0 %v3734_v6 }
  0x51   : > { %3533 = vmatprep.subr.bf16.mxu0 %v3735_v7 }
  0x52   : > { %3548 = vmatpush3.bf16.msra.mxu1 %v3743_v14  ;;  %v3751_v14 = vld [vmem:[%s4750_s4] sm:$0x3f]  }
  0x53   : > { %3549 = vmatprep.subr.bf16.mxu1 %v3745_v16 }
  0x54   : > { %3534 = vmatpush3.bf16.msra.mxu0 %v3735_v7 }
  0x55   : > { %3535 = vmatprep.subr.bf16.mxu0 %v3736_v8 }
  0x56   : > { %3550 = vmatpush3.bf16.msra.mxu1 %v3745_v16  ;;  %v3753_v16 = vld [vmem:[%s4751_s5 + $0x28] sm:$0xff]  }
  0x57   : > { %3551 = vmatprep.subr.bf16.mxu1 %v3747_v18 }
  0x58   : > { %3536 = vmatpush3.bf16.msra.mxu0 %v3736_v8 }
  0x59   : > { %3537 = vmatprep.subr.bf16.mxu0 %v3737_v9 }
  0x5a   : > { %3552 = vmatpush3.bf16.msra.mxu1 %v3747_v18  ;;  %v3755_v18 = vld [vmem:[%s4751_s5 + $0x20] sm:$0xff]  }
  0x5b   : > { %3553 = vmatprep.subr.bf16.mxu1 %v3749_v20 }
  0x5c   : > { %3538 = vmatpush3.bf16.msra.mxu0 %v3737_v9 }
  0x5d   : > { %3559 = vmatprep.subr.bf16.mxu0 %v3740_v11 }
  0x5e   : > { %3554 = vmatpush3.bf16.msra.mxu1 %v3749_v20  ;;  %v3757_v20 = vld [vmem:[%s4751_s5 + $0x18] sm:$0xff]  }
  0x5f   : > { %3540 = vmatmul.mubr.msk.bf16.vlgmr.msra.gmra.mxu0 %vm525_vm1, %v932_v60  ;;  %3575 = vmatprep.subr.bf16.mxu1 %v3965_v63 }
  0x60   : > { %3560 = vmatpush3.bf16.msra.mxu0 %v3740_v11 }
  0x61   : > { %3561 = vmatprep.subr.bf16.mxu0 %v3742_v13 }
  0x64   : > { %3562 = vmatpush3.bf16.msra.mxu0 %v3742_v13 }
  0x65   : > { %3563 = vmatprep.subr.bf16.mxu0 %v3744_v15 }
  0x68   : > { %3564 = vmatpush3.bf16.msra.mxu0 %v3744_v15  ;;  %v3752_v15 = vld [vmem:[%s4750_s4 + $0x8] sm:$0x3f]  }
  0x69   : > { %3565 = vmatprep.subr.bf16.mxu0 %v3746_v17 }
  0x6c   : > { %3566 = vmatpush3.bf16.msra.mxu0 %v3746_v17  ;;  %v3754_v17 = vld [vmem:[%s4751_s5 + $0x58] sm:$0xff]  }
  0x6d   : > { %3567 = vmatprep.subr.bf16.mxu0 %v3748_v19 }
  0x70   : > { %3568 = vmatpush3.bf16.msra.mxu0 %v3748_v19  ;;  %v3756_v19 = vld [vmem:[%s4751_s5 + $0x50] sm:$0xff]  }
  0x71   : > { %3569 = vmatprep.subr.bf16.mxu0 %v3750_v21 }
  0x74   : > { %3570 = vmatpush3.bf16.msra.mxu0 %v3750_v21  ;;  %v3758_v21 = vld [vmem:[%s4751_s5 + $0x48] sm:$0xff]  }
  0x75   : > { %3621 = vmatprep.subr.bf16.mxu0 %v3965_v63 }
  0xef   : > { %v3477_v22 = vpop.f32.mrf.mxu0 }
  0xf0   : > { %v3493_v23 = vpop.f32.mrf.mxu1 }
  0xf1   : > { %v570_v24 = vpop.f32.mrf.mxu0  ;;  %v669_v36 = vadd.f32 %v3493_v23, %v3477_v22 }
  0xf2   : > { %v660_v25 = vpop.f32.mrf.mxu1 }
  0xf3   : > { %v3478_v26 = vpop.f32.mrf.mxu0  ;;  %v661_v37 = vadd.f32 %v660_v25, %v570_v24 }
  0xf4   : > { %v3494_v27 = vpop.f32.mrf.mxu1 }
  0xf5   : > { %v573_v28 = vpop.f32.mrf.mxu0 }
  0xf6   : > { %v663_v29 = vpop.f32.mrf.mxu1 }
  0xf7   : > { %v664_v41 = vadd.f32 %v663_v29, %v573_v28 }
 0x107   : > { %v3509_v30 = vpop.f32.mrf.mxu0 }
 0x108   : > { %v3525_v31 = vpop.f32.mrf.mxu1  ;;  %v786_v38 = vadd.f32 %v3509_v30, %v669_v36 }
 0x109   : > { %v770_v32 = vpop.f32.mrf.mxu0 }
 0x10a   : > { %v897_v33 = vpop.f32.mrf.mxu1  ;;  %v784_v39 = vadd.f32 %v770_v32, %v661_v37  ;;  %v913_v42 = vadd.f32 %v3525_v31, %v786_v38  ;;  %v3760_v37 = vld [vmem:[%s4751_s5 + $0x8] sm:$0xff]   ;;  %v3761_v38 = vld [vmem:[%s4751_s5] sm:$0xff]  }
 0x10b   : > { %v3510_v34 = vpop.f32.mrf.mxu0 }
 0x10c   : > { %v3526_v35 = vpop.f32.mrf.mxu1  ;;  %v911_v44 = vadd.f32 %v897_v33, %v784_v39  ;;  %v3759_v33 = vld [vmem:[%s4751_s5 + $0x10] sm:$0xff]  }
 0x10d   : > { %v773_v40 = vpop.f32.mrf.mxu0 }
 0x10e   : > { %v785_v45 = vadd.f32 %v773_v40, %v664_v41  ;;  %v900_v46 = vpop.f32.mrf.mxu1  ;;  %v3762_v40 = vld [vmem:[%s4751_s5 + $0x40] sm:$0xff]  }
 0x110   : > { %v912_v52 = vadd.f32 %v900_v46, %v785_v45  ;;  %v3765_v45 = vld [vmem:[%s4751_s5 + $0x70] sm:$0xff]  }
 0x11f   : > { %v3541_v43 = vpop.f32.mrf.mxu0 }
 0x120   : > { %v1026_v47 = vadd.f32 %v3541_v43, %v913_v42  ;;  %v3763_v42 = vld [vmem:[%s4751_s5 + $0x38] sm:$0xff]   ;;  %v3764_v43 = vld [vmem:[%s4751_s5 + $0x30] sm:$0xff]  }
 0x121   : > { %v1010_v48 = vpop.f32.mrf.mxu0 }
 0x122   : > { %v1024_v50 = vadd.f32 %v1010_v48, %v911_v44  ;;  %v1036_v53 = vadd.f32 %v3116_v49, %v1026_v47  ;;  %v3766_v47 = vld [vmem:[%s4751_s5 + $0x68] sm:$0xff]   ;;  %v3767_v48 = vld [vmem:[%s4751_s5 + $0x60] sm:$0xff]  }
 0x123   : > { %v3542_v51 = vpop.f32.mrf.mxu0 }
 0x124   : > { %v1034_v55 = vadd.f32 %v3116_v49, %v1024_v50  ;;  %v1039_v58 = vmax.f32 %v1036_v53, 0.0  ;;  %v3770_v51 = vld [vmem:[%s4753_s7 + $0x44] ss:$8 sps:$4 sm:$0xff]   ;;  %v3773_v53 = vld [vmem:[%s4753_s7 + $0x94] ss:$8 sps:$4 sm:$0xff]  }
 0x125   : > { %v1013_v54 = vpop.f32.mrf.mxu0 }
 0x126   : > { %v1025_v56 = vadd.f32 %v1013_v54, %v912_v52  ;;  %v1037_v59 = vmax.f32 %v1034_v55, 0.0  ;;  %v1041_v62 = vpack.c.bf16 %v1039_v58, %v1039_v58  ;;  %v3768_v52 = vld [vmem:[%s4753_s7 + $0x40] ss:$8 sps:$4 sm:$0xff]   ;;  %v3771_v54 = vld [vmem:[%s4753_s7 + $0x90] ss:$8 sps:$4 sm:$0xff]  }
 0x127   : > { %v3776_v55 = vld [vmem:[%s4753_s7 + $0x34] ss:$8 sps:$4 sm:$0xff]   ;;  %v3777_v58 = vld [vmem:[%s4753_s7 + $0x80] ss:$8 sps:$4 sm:$0xff]  }
 0x128   : > { %v1035_v57 = vadd.f32 %v3116_v49, %v1025_v56  ;;  %v3774_v56 = vld [vmem:[%s4753_s7 + $0x30] ss:$8 sps:$4 sm:$0xff]  }
 0x12a   : > { %v1038_v60 = vmax.f32 %v1035_v57, 0.0  ;;  %v3779_v57 = vld [vmem:[%s4753_s7 + $0x84] ss:$8 sps:$4 sm:$0xff]  }
 0x12c   : > { %v1040_v61 = vpack.c.bf16 %v1038_v60, %v1037_v59  ;;  %v3780_v59 = vld [vmem:[%s4753_s7 + $0x20] ss:$8 sps:$4 sm:$0xff]   ;;  %v3782_v60 = vld [vmem:[%s4753_s7 + $0x24] ss:$8 sps:$4 sm:$0xff]  }
 0x12e   : > { %3555 = vmatprep.mubr.msk.bf16.mxu1 %vm1090_vm6, %v1040_v61  ;;  %3571 = vmatprep.mubr.msk.bf16.mxu0 %vm1090_vm6, %v1040_v61  ;;  %v3783_v61 = vld [vmem:[%s4753_s7 + $0x70] ss:$8 sps:$4 sm:$0xff]  }
 0x12f   : > { %3556 = vmatmul.mubr.msk.bf16.vlgmr.msra.gmra.mxu1 %vm1090_vm6, %v1041_v62  ;;  %3572 = vmatmul.mubr.msk.bf16.vlgmr.msra.gmra.mxu0 %vm1090_vm6, %v1041_v62  ;;  %v3785_v62 = vld [vmem:[%s4753_s7 + $0x74] ss:$8 sps:$4 sm:$0xff]  }
 0x130   : > { %3579 = vmatprep.mubr.msk.bf16.mxu1 %vm3966_vm7, %v3965_v63  ;;  %3627 = vmatprep.mubr.msk.bf16.mxu0 %vm3966_vm7, %v3965_v63 }
 0x131   : > { %3622 = vmatpush3.bf16.msra.mxu0 %v3754_v17 }
 0x132   : > { %3623 = vmatprep.subr.bf16.mxu0 %v3965_v63 }
 0x135   : > { %3624 = vmatpush3.bf16.msra.mxu0 %v3756_v19 }
 0x136   : > { %3625 = vmatprep.subr.bf16.mxu0 %v3965_v63 }
 0x139   : > { %3626 = vmatpush3.bf16.msra.mxu0 %v3758_v21 }
 0x13a   : > { %1794 = vmatprep.subr.bf16.mxu0 %v3770_v51  ;;  %v3821_v51 = vld [vmem:[%s4753_s7 + $0x104] ss:$8 sps:$4 sm:$0xff]  }
 0x1ef   : > { %v3557_v0 = vpop.f32.mrf.mxu1  ;;  %v3573_v1 = vpop.f32.mrf.mxu0 }
 0x1f0   : > { %v1244_v2 = vmax.f32 %v3557_v0, %v3573_v1  ;;  %v3788_v0 = vld [vmem:[%s4753_s7 + $0x14] ss:$8 sps:$4 sm:$0xff]   ;;  %v3786_v1 = vld [vmem:[%s4753_s7 + $0x10] ss:$8 sps:$4 sm:$0xff]  }
 0x1f1   : > { %v1131_v3 = vpop.f32.mrf.mxu1  ;;  %v1228_v4 = vpop.f32.mrf.mxu0 }
 0x1f2   : > { %v1246_v5 = vpack.c.bf16 %v1244_v2, %v1244_v2  ;;  %v1242_v11 = vmax.f32 %v1131_v3, %v1228_v4  ;;  %v3791_v2 = vld [vmem:[%s4753_s7 + $0x64] ss:$8 sps:$4 sm:$0xff]   ;;  %v3789_v3 = vld [vmem:[%s4753_s7 + $0x60] ss:$8 sps:$4 sm:$0xff]  }
 0x1f3   : > { %v3558_v6 = vpop.f32.mrf.mxu1  ;;  %v3574_v7 = vpop.f32.mrf.mxu0  ;;  %v3794_v4 = vld [vmem:[%s4753_s7 + $0x4] ss:$8 sps:$4 sm:$0xff]  }
 0x1f4   : > { %v1260_v8 = vsel %vm1258_vm8, %v1246_v5, 0  ;;  %v3792_v5 = vld [vmem:[%s4753_s7] ss:$8 sps:$4 sm:$0xff]   ;;  %v3797_v6 = vld [vmem:[%s4753_s7 + $0x54] ss:$8 sps:$4 sm:$0xff]  }
 0x1f5   : > { %v1134_v9 = vpop.f32.mrf.mxu1  ;;  %v1231_v10 = vpop.f32.mrf.mxu0  ;;  %3576 = vmatpush3.bf16.msra.mxu1 %v1260_v8  ;;  %v3795_v7 = vld [vmem:[%s4753_s7 + $0x50] ss:$8 sps:$4 sm:$0xff]  }
 0x1f6   : > { %v1243_v12 = vmax.f32 %v1134_v9, %v1231_v10  ;;  %3577 = vmatprep.subr.bf16.mxu1 %v3965_v63  ;;  %v3967_v9 = vmov 0   ;;  %v3803_v10 = vld [vmem:[%s4753_s7 + $0x134] ss:$8 sps:$4 sm:$0xff]  }
 0x1f8   : > { %v1245_v13 = vpack.c.bf16 %v1243_v12, %v1242_v11 }
 0x1fa   : > { %3578 = vmatpush3.bf16.msra.mxu1 %v1245_v13 }
 0x1fb   : > { %3583 = vmatprep.subr.bf16.mxu1 %v3965_v63 }
 0x1fd   : > { %3580 = vmatmul.mubr.msk.bf16.vlgmr.msra.gmra.mxu1 %vm1254_vm9, %v3751_v14 }
 0x1fe   : > { %3584 = vmatpush3.bf16.msra.mxu1 %v1260_v8  ;;  %3587 = vmatprep.mubr.msk.bf16.mxu1 %vm3966_vm7, %v3965_v63  ;;  %v3800_v8 = vld [vmem:[%s4753_s7 + $0xe4] ss:$8 sps:$4 sm:$0xff]  }
 0x1ff   : > { %3585 = vmatprep.subr.bf16.mxu1 %v3965_v63 }
 0x202   : > { %3586 = vmatpush3.bf16.msra.mxu1 %v1245_v13 }
 0x203   : > { %3591 = vmatprep.subr.bf16.mxu1 %v3965_v63 }
 0x205   : > { %3588 = vmatmul.mubr.msk.bf16.vlgmr.msra.gmra.mxu1 %vm1254_vm9, %v3752_v15 }
 0x206   : > { %3597 = vmatprep.mubr.msk.bf16.mxu1 %vm3966_vm7, %v3965_v63  ;;  %3592 = vmatpush3.bf16.msra.mxu1 %v3753_v16 }
 0x207   : > { %3593 = vmatprep.subr.bf16.mxu1 %v3965_v63 }
 0x20a   : > { %3594 = vmatpush3.bf16.msra.mxu1 %v3755_v18 }
 0x20b   : > { %3595 = vmatprep.subr.bf16.mxu1 %v3965_v63 }
 0x20e   : > { %3596 = vmatpush3.bf16.msra.mxu1 %v3757_v20 }
 0x20f   : > { %3601 = vmatprep.subr.bf16.mxu1 %v3965_v63 }
 0x2bd   : > { %v1296_v22 = vpop.f32.mrf.mxu1 }
 0x2bf   : > { %v3581_v23 = vpop.f32.mrf.mxu1 }
 0x2c1   : > { %v1299_v24 = vpop.f32.mrf.mxu1 }
 0x2c3   : > { %v3582_v25 = vpop.f32.mrf.mxu1 }
 0x2c5   : > { %v1348_v26 = vpop.f32.mrf.mxu1 }
 0x2c6   : > { %v1355_v27 = vmax.f32 %v1296_v22, %v1348_v26 }
 0x2c7   : > { %v3589_v28 = vpop.f32.mrf.mxu1 }
 0x2c8   : > { %1358 = vst.msk [vmem:[#allocation2] sm:$0xff] %vm1357_vm10, %v1355_v27 }
 0x2c9   : > { %v1351_v29 = vpop.f32.mrf.mxu1 }
 0x2ca   : > { %v1356_v30 = vmax.f32 %v1299_v24, %v1351_v29 }
 0x2cb   : > { %v3590_v31 = vpop.f32.mrf.mxu1 }
 0x2cc   : > { %1360 = vst.msk [vmem:[#allocation2 + $0x8] sm:$0xf] %vm1359_vm11, %v1356_v30  ;;  %v3195_v31 = vld [vmem:[%s4752_s6] ss:$0 sm:$0xff] }
 0x2cf   : > { %v1361_v39 = vld [vmem:[#allocation2] sm:$0xff] }
 0x2d0   : > { %v1362_v41 = vpack.c.bf16 %v1361_v39, %v1361_v39 }
 0x2d3   : > { %v1369_v32 = vld [vmem:[#allocation2 + $0x1] sm:$0xff] }
 0x2d4   : > { %v1571_v34 = vld [vmem:[#allocation2 + $0x3] sm:$0xff]  ;;  %v1370_v35 = vpack.c.bf16 %v1369_v32, %v1369_v32 }
 0x2d5   : > { %v1572_v36 = vpack.c.bf16 %v1571_v34, %v1571_v34  ;;  %v1500_v44 = vld [vmem:[#allocation2 + $0x2] sm:$0xff] }
 0x2d6   : > { %3598 = vmatmul.mubr.msk.bf16.vlgmr.msra.gmra.mxu1 %vm1357_vm10, %v1370_v35  ;;  %v1501_v46 = vpack.c.bf16 %v1500_v44, %v1500_v44  ;;  %v1642_v49 = vld [vmem:[#allocation2 + $0x4] sm:$0xff]  ;;  %v3804_v44 = vld [vmem:[%s4753_s7 + $0xd0] ss:$8 sps:$4 sm:$0xff]  }
 0x2d7   : > { %3628 = vmatmul.mubr.msk.bf16.vlgmr.msra.gmra.mxu0 %vm1357_vm10, %v1572_v36  ;;  %3602 = vmatpush3.bf16.msra.mxu1 %v3759_v33  ;;  %v1643_v50 = vpack.c.bf16 %v1642_v49, %v1642_v49  ;;  %v3818_v49 = vld [vmem:[%s4753_s7 + $0xb4] ss:$8 sps:$4 sm:$0xff]  }
 0x2d8   : > { %3607 = vmatprep.mubr.msk.bf16.mxu1 %vm3966_vm7, %v3965_v63  ;;  %3603 = vmatprep.subr.bf16.mxu1 %v3965_v63 }
 0x2d9   : > { %1795 = vmatpush1.bf16.msra.mxu0 %v3768_v52  ;;  %1820 = vmatprep.mubr.bf16.mxu0 %v3967_v9  ;;  %v3816_v52 = vld [vmem:[%s4753_s7 + $0xb0] ss:$8 sps:$4 sm:$0xff]  }
 0x2da   : > { %1796 = vmatprep.subr.bf16.mxu0 %v3776_v55  ;;  %v3827_v55 = vld [vmem:[%s4753_s7 + $0xf4] ss:$8 sps:$4 sm:$0xff]  }
 0x2db   : > { %3604 = vmatpush3.bf16.msra.mxu1 %v3760_v37 }
 0x2dc   : > { %3605 = vmatprep.subr.bf16.mxu1 %v3965_v63 }
 0x2dd   : > { %1797 = vmatpush1.bf16.msra.mxu0 %v3774_v56  ;;  %v3822_v56 = vld [vmem:[%s4753_s7 + $0xa0] ss:$8 sps:$4 sm:$0xff]  }
 0x2de   : > { %1798 = vmatprep.subr.bf16.mxu0 %v3782_v60  ;;  %v3828_v60 = vld [vmem:[%s4753_s7 + $0x180] ss:$8 sps:$4 sm:$0xff]  }
 0x2df   : > { %3606 = vmatpush3.bf16.msra.mxu1 %v3761_v38  ;;  %v3798_v38 = vld [vmem:[%s4753_s7 + $0xe0] ss:$8 sps:$4 sm:$0xff]  }
 0x2e0   : > { %3611 = vmatprep.subr.bf16.mxu1 %v3965_v63 }
 0x2e1   : > { %1799 = vmatpush1.bf16.msra.mxu0 %v3780_v59  ;;  %v3833_v59 = vld [vmem:[%s4753_s7 + $0x1d4] ss:$8 sps:$4 sm:$0xff]  }
 0x2e2   : > { %3608 = vmatmul.mubr.msk.bf16.vlgmr.msra.gmra.mxu1 %vm1357_vm10, %v1362_v41  ;;  %1800 = vmatprep.subr.bf16.mxu0 %v3788_v0  ;;  %v3801_v41 = vld [vmem:[%s4753_s7 + $0x130] ss:$8 sps:$4 sm:$0xff]  }
 0x2e3   : > { %3612 = vmatpush3.bf16.msra.mxu1 %v3762_v40  ;;  %3617 = vmatprep.mubr.msk.bf16.mxu1 %vm3966_vm7, %v3965_v63  ;;  %v3806_v40 = vld [vmem:[%s4753_s7 + $0xd4] ss:$8 sps:$4 sm:$0xff]   ;;  %v3831_v0 = vld [vmem:[%s4753_s7 + $0x1d0] ss:$8 sps:$4 sm:$0xff]  }
 0x2e4   : > { %3613 = vmatprep.subr.bf16.mxu1 %v3965_v63 }
 0x2e5   : > { %1801 = vmatpush1.bf16.msra.mxu0 %v3786_v1 }
 0x2e6   : > { %1802 = vmatprep.subr.bf16.mxu0 %v3794_v4  ;;  %v3842_v4 = vld [vmem:[%s4753_s7 + $0x164] ss:$8 sps:$4 sm:$0xff]  }
 0x2e7   : > { %3614 = vmatpush3.bf16.msra.mxu1 %v3763_v42 }
 0x2e8   : > { %3615 = vmatprep.subr.bf16.mxu1 %v3965_v63 }
 0x2e9   : > { %1803 = vmatpush1.bf16.msra.mxu0 %v3792_v5  ;;  %v3837_v5 = vld [vmem:[%s4753_s7 + $0x1c0] ss:$8 sps:$4 sm:$0xff]  }
 0x2ea   : > { %2046 = vmatprep.subr.bf16.mxu0 %v3800_v8  ;;  %v3848_v8 = vld [vmem:[%s4753_s7 + $0x154] ss:$8 sps:$4 sm:$0xff]  }
 0x2eb   : > { %3616 = vmatpush3.bf16.msra.mxu1 %v3764_v43  ;;  %v3809_v43 = vld [vmem:[%s4753_s7 + $0x124] ss:$8 sps:$4 sm:$0xff]  }
 0x2ec   : > { %3631 = vmatprep.subr.bf16.mxu1 %v3965_v63 }
 0x2ee   : > { %3618 = vmatmul.mubr.msk.bf16.vlgmr.msra.gmra.mxu1 %vm1357_vm10, %v1501_v46  ;;  %v3807_v46 = vld [vmem:[%s4753_s7 + $0x120] ss:$8 sps:$4 sm:$0xff]  }
 0x2ef   : > { %3632 = vmatpush3.bf16.msra.mxu1 %v3765_v45  ;;  %3637 = vmatprep.mubr.msk.bf16.mxu1 %vm3966_vm7, %v3965_v63  ;;  %v3812_v45 = vld [vmem:[%s4753_s7 + $0xc4] ss:$8 sps:$4 sm:$0xff]  }
 0x2f0   : > { %3633 = vmatprep.subr.bf16.mxu1 %v3965_v63 }
 0x2f3   : > { %3634 = vmatpush3.bf16.msra.mxu1 %v3766_v47  ;;  %v3815_v47 = vld [vmem:[%s4753_s7 + $0x114] ss:$8 sps:$4 sm:$0xff]  }
 0x2f4   : > { %3635 = vmatprep.subr.bf16.mxu1 %v3965_v63 }
 0x2f7   : > { %3636 = vmatpush3.bf16.msra.mxu1 %v3767_v48  ;;  %v3810_v48 = vld [vmem:[%s4753_s7 + $0xc0] ss:$8 sps:$4 sm:$0xff]  }
 0x2f8   : > { %1920 = vmatprep.subr.bf16.mxu1 %v3773_v53  ;;  %v3824_v53 = vld [vmem:[%s4753_s7 + $0xa4] ss:$8 sps:$4 sm:$0xff]  }
 0x2fa   : > { %3638 = vmatmul.mubr.msk.bf16.vlgmr.msra.gmra.mxu1 %vm1357_vm10, %v1643_v50  ;;  %v3813_v50 = vld [vmem:[%s4753_s7 + $0x110] ss:$8 sps:$4 sm:$0xff]  }
 0x2fb   : > { %1921 = vmatpush1.bf16.msra.mxu1 %v3771_v54  ;;  %1946 = vmatprep.mubr.bf16.mxu1 %v3967_v9  ;;  %v3819_v54 = vld [vmem:[%s4753_s7 + $0x100] ss:$8 sps:$4 sm:$0xff]  }
 0x2fc   : > { %1922 = vmatprep.subr.bf16.mxu1 %v3779_v57  ;;  %v3830_v57 = vld [vmem:[%s4753_s7 + $0x184] ss:$8 sps:$4 sm:$0xff]  }
 0x2ff   : > { %1923 = vmatpush1.bf16.msra.mxu1 %v3777_v58  ;;  %v3825_v58 = vld [vmem:[%s4753_s7 + $0xf0] ss:$8 sps:$4 sm:$0xff]  }
 0x300   : > { %1924 = vmatprep.subr.bf16.mxu1 %v3785_v62  ;;  %v3836_v62 = vld [vmem:[%s4753_s7 + $0x174] ss:$8 sps:$4 sm:$0xff]  }
 0x303   : > { %1925 = vmatpush1.bf16.msra.mxu1 %v3783_v61 }
 0x304   : > { %1926 = vmatprep.subr.bf16.mxu1 %v3791_v2  ;;  %v3839_v2 = vld [vmem:[%s4753_s7 + $0x1c4] ss:$8 sps:$4 sm:$0xff]  }
 0x307   : > { %1927 = vmatpush1.bf16.msra.mxu1 %v3789_v3  ;;  %v3834_v3 = vld [vmem:[%s4753_s7 + $0x170] ss:$8 sps:$4 sm:$0xff]  }
 0x308   : > { %1928 = vmatprep.subr.bf16.mxu1 %v3797_v6  ;;  %v3845_v6 = vld [vmem:[%s4753_s7 + $0x1b4] ss:$8 sps:$4 sm:$0xff]  }
 0x30b   : > { %1929 = vmatpush1.bf16.msra.mxu1 %v3795_v7  ;;  %v3840_v7 = vld [vmem:[%s4753_s7 + $0x160] ss:$8 sps:$4 sm:$0xff]  }
 0x30c   : > { %2171 = vmatprep.subr.bf16.mxu1 %v3803_v10  ;;  %v3843_v10 = vld [vmem:[%s4753_s7 + $0x1b0] ss:$8 sps:$4 sm:$0xff]  }
 0x396   : > { %v1433_v11 = vpop.f32.mrf.mxu1 }
 0x397   : > { %v1635_v12 = vpop.f32.mrf.mxu0 }
 0x398   : > { %v3599_v13 = vpop.f32.mrf.mxu1 }
 0x399   : > { %v3629_v14 = vpop.f32.mrf.mxu0  ;;  %v3854_v13 = vld [vmem:[%s4753_s7 + $0x144] ss:$8 sps:$4 sm:$0xff]  }
 0x39a   : > { %v1436_v15 = vpop.f32.mrf.mxu1  ;;  %v3849_v14 = vld [vmem:[%s4753_s7 + $0x1a0] ss:$8 sps:$4 sm:$0xff]  }
 0x39b   : > { %v1638_v16 = vpop.f32.mrf.mxu0  ;;  %v3857_v15 = vld [vmem:[%s4753_s7 + $0x194] ss:$8 sps:$4 sm:$0xff]  }
 0x39c   : > { %v3600_v17 = vpop.f32.mrf.mxu1  ;;  %v3852_v16 = vld [vmem:[%s4753_s7 + $0x140] ss:$8 sps:$4 sm:$0xff]  }
 0x39d   : > { %v3630_v18 = vpop.f32.mrf.mxu0  ;;  %v3860_v17 = vld [vmem:[%s4753_s7 + $0x224] ss:$8 sps:$4 sm:$0xff]  }
 0x39e   : > { %v3855_v18 = vld [vmem:[%s4753_s7 + $0x190] ss:$8 sps:$4 sm:$0xff]  }
 0x3a2   : > { %v1494_v19 = vpop.f32.mrf.mxu1 }
 0x3a3   : > { %v1495_v26 = vadd.f32 %v1494_v19, %v1433_v11  ;;  %v3851_v11 = vld [vmem:[%s4753_s7 + $0x1a4] ss:$8 sps:$4 sm:$0xff]   ;;  %v3863_v19 = vld [vmem:[%s4753_s7 + $0x274] ss:$8 sps:$4 sm:$0xff]  }
 0x3a4   : > { %v3609_v20 = vpop.f32.mrf.mxu1 }
 0x3a5   : > { %v3858_v20 = vld [vmem:[%s4753_s7 + $0x220] ss:$8 sps:$4 sm:$0xff]  }
 0x3a6   : > { %v1497_v21 = vpop.f32.mrf.mxu1 }
 0x3a8   : > { %v3610_v22 = vpop.f32.mrf.mxu1 }
 0x3a9   : > { %v3866_v22 = vld [vmem:[%s4753_s7 + $0x214] ss:$8 sps:$4 sm:$0xff]  }
 0x3ae   : > { %v1564_v23 = vpop.f32.mrf.mxu1 }
 0x3af   : > { %v1570_v28 = vadd.f32 %v1564_v23, %v1495_v26  ;;  %v3861_v23 = vld [vmem:[%s4753_s7 + $0x270] ss:$8 sps:$4 sm:$0xff]  }
 0x3b0   : > { %v3619_v24 = vpop.f32.mrf.mxu1  ;;  %v3864_v26 = vld [vmem:[%s4753_s7 + $0x210] ss:$8 sps:$4 sm:$0xff]  }
 0x3b1   : > { %v1641_v29 = vadd.f32 %v1635_v12, %v1570_v28  ;;  %v3846_v12 = vld [vmem:[%s4753_s7 + $0x150] ss:$8 sps:$4 sm:$0xff]   ;;  %v3867_v28 = vld [vmem:[%s4753_s7 + $0x260] ss:$8 sps:$4 sm:$0xff]  }
 0x3b2   : > { %v1567_v25 = vpop.f32.mrf.mxu1 }
 0x3b3   : > { %v3869_v25 = vld [vmem:[%s4753_s7 + $0x264] ss:$8 sps:$4 sm:$0xff]  }
 0x3b4   : > { %v3620_v27 = vpop.f32.mrf.mxu1 }
 0x3b5   : > { %v3872_v27 = vld [vmem:[%s4753_s7 + $0x204] ss:$8 sps:$4 sm:$0xff]  }
 0x3ba   : > { %v1706_v30 = vpop.f32.mrf.mxu1 }
 0x3bb   : > { %v1712_v32 = vadd.f32 %v1706_v30, %v1641_v29  ;;  %v3875_v29 = vld [vmem:[%s4753_s7 + $0x254] ss:$8 sps:$4 sm:$0xff]   ;;  %v3870_v30 = vld [vmem:[%s4753_s7 + $0x200] ss:$8 sps:$4 sm:$0xff]  }
 0x3bc   : > { %v3639_v33 = vpop.f32.mrf.mxu1 }
 0x3bd   : > { %v1720_v34 = vadd.f32 %v3195_v31, %v1712_v32  ;;  %v3878_v31 = vld [vmem:[%s4753_s7 + $0x1f4] ss:$8 sps:$4 sm:$0xff]   ;;  %v3873_v32 = vld [vmem:[%s4753_s7 + $0x250] ss:$8 sps:$4 sm:$0xff]   ;;  %v3881_v33 = vld [vmem:[%s4753_s7 + $0x244] ss:$8 sps:$4 sm:$0xff]  }
 0x3be   : > { %v1709_v35 = vpop.f32.mrf.mxu1 }
 0x3bf   : > { %v1721_v36 = vmax.f32 %v1720_v34, 0.0  ;;  %v3876_v34 = vld [vmem:[%s4753_s7 + $0x1f0] ss:$8 sps:$4 sm:$0xff]   ;;  %v3884_v35 = vld [vmem:[%s4753_s7 + $0x1e4] ss:$8 sps:$4 sm:$0xff]  }
 0x3c0   : > { %v3640_v37 = vpop.f32.mrf.mxu1 }
 0x3c1   : > { %v4430_v39 = vpack.c.bf16 %v1721_v36, %v1721_v36  ;;  %v3879_v36 = vld [vmem:[%s4753_s7 + $0x240] ss:$8 sps:$4 sm:$0xff]   ;;  %v3887_v37 = vld [vmem:[%s4753_s7 + $0x234] ss:$8 sps:$4 sm:$0xff]  }
 0x3c3   : > { %3206 = vmatmul.mubr.msk.bf16.vlgmr.msra.gmra.mxu0 %vm1784_vm12, %v4430_v39  ;;  %v4441_v42 = vshrl.u32 %v4430_v39, 16  ;;  %v1986_v61 = vrot.slane %v4430_v39, 1  ;;  %v2236_v21 = vrot.slane %v4430_v39, 2 }
 0x3c4   : > { %2047 = vmatpush1.bf16.msra.mxu0 %v3798_v38  ;;  %2072 = vmatprep.mubr.bf16.mxu0 %v3967_v9  ;;  %v3882_v38 = vld [vmem:[%s4753_s7 + $0x1e0] ss:$8 sps:$4 sm:$0xff]  }
 0x3c5   : > { %3227 = vmatmul.mubr.msk.bf16.vlgmr.msra.gmra.mxu1 %vm1784_vm12, %v4441_v42  ;;  %2048 = vmatprep.subr.bf16.mxu0 %v3806_v40  ;;  %v2111_v1 = vrot.slane %v4441_v42, 1  ;;  %v2361_v24 = vrot.slane %v4441_v42, 2  ;;  %v3885_v40 = vld [vmem:[%s4753_s7 + $0x230] ss:$8 sps:$4 sm:$0xff]  }
 0x3c6   : > { %2172 = vmatpush1.bf16.msra.mxu1 %v3801_v41  ;;  %2197 = vmatprep.mubr.bf16.mxu1 %v3967_v9  ;;  %v2486_v41 = vrot.slane %v4430_v39, 3  ;;  %v3889_v39 = vld [vmem:[%s4755_s9 + $0x30] sm:$0xff]  }
 0x3c7   : > { %2173 = vmatprep.subr.bf16.mxu1 %v3809_v43  ;;  %v2611_v43 = vrot.slane %v4441_v42, 3  ;;  %v3890_v42 = vld [vmem:[%s4755_s9 + $0x28] sm:$0xff]  }
 0x3c8   : > { %2049 = vmatpush1.bf16.msra.mxu0 %v3804_v44  ;;  %v3888_v44 = vld [vmem:[%s4755_s9 + $0x38] sm:$0xff]  }
 0x3c9   : > { %2050 = vmatprep.subr.bf16.mxu0 %v3812_v45  ;;  %v3891_v45 = vld [vmem:[%s4755_s9 + $0x20] sm:$0xff]  }
 0x3ca   : > { %2174 = vmatpush1.bf16.msra.mxu1 %v3807_v46  ;;  %v3892_v46 = vld [vmem:[%s4755_s9 + $0x18] sm:$0xff]  }
 0x3cb   : > { %2175 = vmatprep.subr.bf16.mxu1 %v3815_v47  ;;  %v3893_v47 = vld [vmem:[%s4755_s9 + $0x10] sm:$0xff]  }
 0x3cc   : > { %2051 = vmatpush1.bf16.msra.mxu0 %v3810_v48  ;;  %v3894_v48 = vld [vmem:[%s4755_s9 + $0x8] sm:$0xff]  }
 0x3cd   : > { %2052 = vmatprep.subr.bf16.mxu0 %v3818_v49  ;;  %v3895_v49 = vld [vmem:[%s4755_s9] sm:$0xff]  }
 0x3ce   : > { %2176 = vmatpush1.bf16.msra.mxu1 %v3813_v50  ;;  %v3896_v50 = vld [vmem:[%s4755_s9 + $0x48] ss:$0 sps:$4 sm:$0x77]  }
 0x3cf   : > { %2177 = vmatprep.subr.bf16.mxu1 %v3821_v51  ;;  %v2822_v51 = vsel %vm2820_vm13, %v3896_v50, 0 }
 0x3d0   : > { %2053 = vmatpush1.bf16.msra.mxu0 %v3816_v52  ;;  %v3897_v52 = vld [vmem:[%s4755_s9 + $0x40] sm:$0xff]  }
 0x3d1   : > { %2054 = vmatprep.subr.bf16.mxu0 %v3824_v53  ;;  %v3898_v53 = vld [vmem:[%s4757_s11 + $0x20] sm:$0xff]  }
 0x3d2   : > { %2178 = vmatpush1.bf16.msra.mxu1 %v3819_v54  ;;  %v3899_v54 = vld [vmem:[%s4757_s11 + $0x18] sm:$0xff]  }
 0x3d3   : > { %2179 = vmatprep.subr.bf16.mxu1 %v3827_v55  ;;  %v3900_v55 = vld [vmem:[%s4757_s11 + $0x10] sm:$0xff]  }
 0x3d4   : > { %2055 = vmatpush1.bf16.msra.mxu0 %v3822_v56 }
 0x3d5   : > { %2296 = vmatprep.subr.bf16.mxu0 %v3830_v57 }
 0x3d6   : > { %2180 = vmatpush1.bf16.msra.mxu1 %v3825_v58 }
 0x3d7   : > { %3248 = vmatmul.mubr.msk.bf16.vlgmr.msra.gmra.mxu0 %vm1784_vm12, %v1986_v61  ;;  %2421 = vmatprep.subr.bf16.mxu1 %v3833_v59 }
 0x3d8   : > { %2297 = vmatpush1.bf16.msra.mxu0 %v3828_v60  ;;  %2322 = vmatprep.mubr.bf16.mxu0 %v3967_v9 }
 0x3d9   : > { %3269 = vmatmul.mubr.msk.bf16.vlgmr.msra.gmra.mxu1 %vm1784_vm12, %v2111_v1  ;;  %2298 = vmatprep.subr.bf16.mxu0 %v3836_v62 }
 0x3da   : > { %2422 = vmatpush1.bf16.msra.mxu1 %v3831_v0  ;;  %2447 = vmatprep.mubr.bf16.mxu1 %v3967_v9 }
 0x3db   : > { %2423 = vmatprep.subr.bf16.mxu1 %v3839_v2 }
 0x3dc   : > { %2299 = vmatpush1.bf16.msra.mxu0 %v3834_v3 }
 0x3dd   : > { %2300 = vmatprep.subr.bf16.mxu0 %v3842_v4 }
 0x3de   : > { %2424 = vmatpush1.bf16.msra.mxu1 %v3837_v5 }
 0x3df   : > { %2425 = vmatprep.subr.bf16.mxu1 %v3845_v6 }
 0x3e0   : > { %2301 = vmatpush1.bf16.msra.mxu0 %v3840_v7 }
 0x3e1   : > { %2302 = vmatprep.subr.bf16.mxu0 %v3848_v8  ;;  %v3968_v8 = vmov 1966171168  }
 0x3e2   : > { %2426 = vmatpush1.bf16.msra.mxu1 %v3843_v10  ;;  %v1833_v10 = vunpack.c.l.s4 %v3968_v8  ;;  %v3902_v8 = vld [vmem:[%s4757_s11] sm:$0xff]  }
 0x3e3   : > { %2427 = vmatprep.subr.bf16.mxu1 %v3851_v11  ;;  %v1835_v11 = vlaneseq }
 0x3e4   : > { %2303 = vmatpush1.bf16.msra.mxu0 %v3846_v12  ;;  %v1834_v12 = vunpack.c.0.s8 %v1833_v10  ;;  %v2758_v10 = vld [vmem:[%s4756_s10] sm:$0x1] }
 0x3e5   : > { %2304 = vmatprep.subr.bf16.mxu0 %v3854_v13  ;;  %v1836_v13 = vshrl.u32 %v1835_v11, 7 }
 0x3e6   : > { %2428 = vmatpush1.bf16.msra.mxu1 %v3849_v14 }
 0x3e7   : > { %2429 = vmatprep.subr.bf16.mxu1 %v3857_v15  ;;  %v1837_v15 = vsub.s32 %v1834_v12, %v1836_v13 }
 0x3e8   : > { %2305 = vmatpush1.bf16.msra.mxu0 %v3852_v16 }
 0x3e9   : > { %2546 = vmatprep.subr.bf16.mxu0 %v3860_v17 }
 0x3ea   : > { %2430 = vmatpush1.bf16.msra.mxu1 %v3855_v18 }
 0x3eb   : > { %3290 = vmatmul.mubr.msk.bf16.vlgmr.msra.gmra.mxu0 %vm1784_vm12, %v2236_v21  ;;  %2671 = vmatprep.subr.bf16.mxu1 %v3863_v19 }
 0x3ec   : > { %2547 = vmatpush1.bf16.msra.mxu0 %v3858_v20  ;;  %2572 = vmatprep.mubr.bf16.mxu0 %v3967_v9 }
 0x3ed   : > { %3311 = vmatmul.mubr.msk.bf16.vlgmr.msra.gmra.mxu1 %vm1784_vm12, %v2361_v24  ;;  %2548 = vmatprep.subr.bf16.mxu0 %v3866_v22 }
 0x3ee   : > { %2672 = vmatpush1.bf16.msra.mxu1 %v3861_v23  ;;  %2697 = vmatprep.mubr.bf16.mxu1 %v3967_v9 }
 0x3ef   : > { %2673 = vmatprep.subr.bf16.mxu1 %v3869_v25 }
 0x3f0   : > { %2549 = vmatpush1.bf16.msra.mxu0 %v3864_v26 }
 0x3f1   : > { %2550 = vmatprep.subr.bf16.mxu0 %v3872_v27 }
 0x3f2   : > { %2674 = vmatpush1.bf16.msra.mxu1 %v3867_v28  ;;  %v1723_v28 = vld [vmem:[%s4754_s8] sm:$0x3] }
 0x3f3   : > { %2675 = vmatprep.subr.bf16.mxu1 %v3875_v29 }
 0x3f4   : > { %2551 = vmatpush1.bf16.msra.mxu0 %v3870_v30 }
 0x3f5   : > { %2552 = vmatprep.subr.bf16.mxu0 %v3878_v31 }
 0x3f6   : > { %2676 = vmatpush1.bf16.msra.mxu1 %v3873_v32 }
 0x3f7   : > { %2677 = vmatprep.subr.bf16.mxu1 %v3881_v33 }
 0x3f8   : > { %2553 = vmatpush1.bf16.msra.mxu0 %v3876_v34 }
 0x3f9   : > { %2554 = vmatprep.subr.bf16.mxu0 %v3884_v35 }
 0x3fa   : > { %2678 = vmatpush1.bf16.msra.mxu1 %v3879_v36 }
 0x3fb   : > { %2679 = vmatprep.subr.bf16.mxu1 %v3887_v37 }
 0x3fc   : > { %2555 = vmatpush1.bf16.msra.mxu0 %v3882_v38 }
 0x3fd   : > { %2824 = vmatprep.subr.bf16.mxu0 %v3967_v9 }
 0x3fe   : > { %2680 = vmatpush1.bf16.msra.mxu1 %v3885_v40 }
 0x3ff   : > { %3332 = vmatmul.mubr.msk.bf16.vlgmr.msra.gmra.mxu0 %vm1784_vm12, %v2486_v41  ;;  %3641 = vmatprep.subr.bf16.mxu1 %v3965_v63 }
 0x400   : > { %2825 = vmatpush1.bf16.msra.mxu0 %v3888_v44 }
 0x401   : > { %3353 = vmatmul.mubr.msk.bf16.vlgmr.msra.gmra.mxu1 %vm1784_vm12, %v2611_v43  ;;  %2826 = vmatprep.subr.bf16.mxu0 %v3967_v9 }
 0x402   : > { %3651 = vmatprep.mubr.msk.bf16.mxu1 %vm3966_vm7, %v3965_v63  ;;  %3642 = vmatpush3.bf16.msra.mxu1 %v3898_v53 }
 0x403   : > { %3643 = vmatprep.subr.bf16.mxu1 %v3965_v63 }
 0x404   : > { %2827 = vmatpush1.bf16.msra.mxu0 %v3889_v39 }
 0x405   : > { %2828 = vmatprep.subr.bf16.mxu0 %v3967_v9 }
 0x406   : > { %3644 = vmatpush3.bf16.msra.mxu1 %v3899_v54 }
 0x407   : > { %3645 = vmatprep.subr.bf16.mxu1 %v3965_v63 }
 0x408   : > { %2829 = vmatpush1.bf16.msra.mxu0 %v3890_v42 }
 0x409   : > { %2830 = vmatprep.subr.bf16.mxu0 %v3967_v9 }
 0x40a   : > { %3646 = vmatpush3.bf16.msra.mxu1 %v3900_v55 }
 0x40b   : > { %3647 = vmatprep.subr.bf16.mxu1 %v3965_v63 }
 0x40c   : > { %2831 = vmatpush1.bf16.msra.mxu0 %v3891_v45 }
 0x40d   : > { %2832 = vmatprep.subr.bf16.mxu0 %v3967_v9 }
 0x410   : > { %2833 = vmatpush1.bf16.msra.mxu0 %v3892_v46 }
 0x411   : > { %2834 = vmatprep.subr.bf16.mxu0 %v3967_v9 }
 0x414   : > { %2835 = vmatpush1.bf16.msra.mxu0 %v3893_v47 }
 0x415   : > { %2836 = vmatprep.subr.bf16.mxu0 %v3967_v9 }
 0x418   : > { %2837 = vmatpush1.bf16.msra.mxu0 %v3894_v48 }
 0x419   : > { %2838 = vmatprep.subr.bf16.mxu0 %v3967_v9 }
 0x41c   : > { %2839 = vmatpush1.bf16.msra.mxu0 %v3895_v49 }
 0x41d   : > { %2852 = vmatprep.subr.bf16.mxu0 %v3967_v9 }
 0x420   : > { %2853 = vmatpush2.bf16.msra.mxu0 %v2822_v51 }
 0x421   : > { %2854 = vmatprep.subr.bf16.mxu0 %v3967_v9 }
 0x424   : > { %2855 = vmatpush2.bf16.msra.mxu0 %v3897_v52 }
 0x483   : > { %v1822_v9 = vpop.f32.mrf.mxu0 }
 0x485   : > { %v1824_v56 = vpop.f32.mrf.mxu0  ;;  %v1948_v57 = vpop.f32.mrf.mxu1 }
 0x486   : > { %v1831_v14 = vcombine.low %v1822_v9, %v1824_v56 }
 0x487   : > { %v1826_v58 = vpop.f32.mrf.mxu0  ;;  %v1950_v59 = vpop.f32.mrf.mxu1 }
 0x488   : > { %v1838_v19 = vrot.slane %v1831_v14, %v1837_v15  ;;  %v1957_v20 = vcombine.low %v1948_v57, %v1950_v59 }
 0x489   : > { %v1827_v60 = vpop.f32.mrf.mxu0  ;;  %v1952_v61 = vpop.f32.mrf.mxu1 }
 0x48a   : > { %v1845_v26 = vrot.slane %v1838_v19, %v1837_v15  ;;  %v1964_v27 = vrot.slane %v1957_v20, %v1837_v15 }
 0x48b   : > { %v1953_v62 = vpop.f32.mrf.mxu1 }
 0x48c   : > { %v1847_v32 = vadd.f32 %v1845_v26, %v1723_v28  ;;  %v1971_v33 = vrot.slane %v1964_v27, %v1837_v15 }
 0x48e   : > { %v1973_v37 = vadd.f32 %v1971_v33, %v1847_v32 }
 0x497   : > { %v2074_v0 = vpop.f32.mrf.mxu0 }
 0x499   : > { %v2076_v1 = vpop.f32.mrf.mxu0  ;;  %v2199_v2 = vpop.f32.mrf.mxu1 }
 0x49a   : > { %v2083_v23 = vcombine.low %v2074_v0, %v2076_v1  ;;  %v2733_v0 = vsub.s32 1, %v1836_v13  ;;  %v2729_v1 = vsub.s32 0, %v1836_v13 }
 0x49b   : > { %v2078_v3 = vpop.f32.mrf.mxu0  ;;  %v2201_v4 = vpop.f32.mrf.mxu1 }
 0x49c   : > { %v2090_v30 = vrot.slane %v2083_v23, %v1837_v15  ;;  %v2208_v31 = vcombine.low %v2199_v2, %v2201_v4 }
 0x49d   : > { %v2079_v5 = vpop.f32.mrf.mxu0  ;;  %v2203_v6 = vpop.f32.mrf.mxu1 }
 0x49e   : > { %v2097_v35 = vrot.slane %v2090_v30, %v1837_v15  ;;  %v2215_v36 = vrot.slane %v2208_v31, %v1837_v15 }
 0x49f   : > { %v2204_v7 = vpop.f32.mrf.mxu1 }
 0x4a0   : > { %v2099_v41 = vadd.f32 %v2097_v35, %v1973_v37  ;;  %v2222_v43 = vrot.slane %v2215_v36, %v1837_v15  ;;  %v3901_v7 = vld [vmem:[%s4757_s11 + $0x8] sm:$0xff]  }
 0x4a1   : > { %3648 = vmatpush3.bf16.msra.mxu1 %v3901_v7 }
 0x4a2   : > { %v2224_v45 = vadd.f32 %v2222_v43, %v2099_v41  ;;  %3649 = vmatprep.subr.bf16.mxu1 %v3965_v63  ;;  %v2876_v63 = vld [vmem:[%s4758_s12] sm:$0x1] }
 0x4a5   : > { %3650 = vmatpush3.bf16.msra.mxu1 %v3902_v8 }
 0x4ab   : > { %v2324_v16 = vpop.f32.mrf.mxu0 }
 0x4ad   : > { %v2326_v17 = vpop.f32.mrf.mxu0  ;;  %v2449_v18 = vpop.f32.mrf.mxu1 }
 0x4ae   : > { %v2333_v34 = vcombine.low %v2324_v16, %v2326_v17 }
 0x4af   : > { %v2328_v21 = vpop.f32.mrf.mxu0  ;;  %v2451_v22 = vpop.f32.mrf.mxu1 }
 0x4b0   : > { %v2340_v38 = vrot.slane %v2333_v34, %v1837_v15  ;;  %v2458_v40 = vcombine.low %v2449_v18, %v2451_v22 }
 0x4b1   : > { %v2329_v24 = vpop.f32.mrf.mxu0  ;;  %v2453_v25 = vpop.f32.mrf.mxu1 }
 0x4b2   : > { %v2347_v44 = vrot.slane %v2340_v38, %v1837_v15  ;;  %v2465_v39 = vrot.slane %v2458_v40, %v1837_v15 }
 0x4b3   : > { %v2454_v29 = vpop.f32.mrf.mxu1 }
 0x4b4   : > { %v2349_v48 = vadd.f32 %v2347_v44, %v2224_v45  ;;  %v2472_v49 = vrot.slane %v2465_v39, %v1837_v15 }
 0x4b6   : > { %v2474_v56 = vadd.f32 %v2472_v49, %v2349_v48 }
 0x4bf   : > { %v2574_v42 = vpop.f32.mrf.mxu0 }
 0x4c1   : > { %v2576_v46 = vpop.f32.mrf.mxu0  ;;  %v2699_v47 = vpop.f32.mrf.mxu1 }
 0x4c2   : > { %v2583_v50 = vcombine.low %v2574_v42, %v2576_v46 }
 0x4c3   : > { %v2578_v51 = vpop.f32.mrf.mxu0  ;;  %v2701_v52 = vpop.f32.mrf.mxu1 }
 0x4c4   : > { %v2590_v53 = vrot.slane %v2583_v50, %v1837_v15  ;;  %v2708_v54 = vcombine.low %v2699_v47, %v2701_v52 }
 0x4c5   : > { %v2579_v55 = vpop.f32.mrf.mxu0  ;;  %v2703_v9 = vpop.f32.mrf.mxu1 }
 0x4c6   : > { %v2597_v57 = vrot.slane %v2590_v53, %v1837_v15  ;;  %v2715_v58 = vrot.slane %v2708_v54, %v1837_v15 }
 0x4c7   : > { %v2704_v59 = vpop.f32.mrf.mxu1 }
 0x4c8   : > { %v2599_v60 = vadd.f32 %v2597_v57, %v2474_v56  ;;  %v2722_v61 = vrot.slane %v2715_v58, %v1837_v15 }
 0x4ca   : > { %v2724_v62 = vadd.f32 %v2722_v61, %v2599_v60 }
 0x4cc   : > { %v2725_v2 = vmax.f32 %v2724_v62, 0.0 }
 0x4ce   : > { %v2734_v3 = vrot.slane %v2725_v2, %v2733_v0  ;;  %v2730_v4 = vrot.slane %v2725_v2, %v2729_v1 }
 0x4d0   : > { %v2738_v5 = vpack.c.bf16 %v2734_v3, %v2734_v3  ;;  %v2737_v6 = vpack.c.bf16 %v2730_v4, %v2730_v4 }
 0x4d2   : > { %3364 = vmatprep.mubr.msk.bf16.mxu0 %vm2816_vm14, %v2738_v5 }
 0x4d3   : > { %2857 = vmatmul.mubr.bf16.vlgmr.msra.gmra.mxu0 %v2737_v6 }
 0x593   : > { %v2858_v11 = vpop.f32.mrf.mxu0 }
 0x594   : > { %v2859_v12 = vadd.f32 %v2858_v11, %v2758_v10 }
 0x595   : > { %v2860_v13 = vpop.f32.mrf.mxu0 }
 0x596   : > { %v2864_v14 = vmax.f32 %v2859_v12, 0.0 }
 0x597   : > { %v2861_v15 = vpop.f32.mrf.mxu0 }
 0x598   : > { %v2865_v16 = vpack.c.bf16 %v2864_v14, %v2864_v14 }
 0x599   : > { %v2862_v17 = vpop.f32.mrf.mxu0 }
 0x59a   : > { %3652 = vmatmul.mubr.msk.bf16.vlgmr.msra.gmra.mxu1 %vm1784_vm12, %v2865_v16 }
 0x65a   : > { %v2944_v18 = vpop.f32.mrf.mxu1 }
 0x65b   : > { %v2945_v19 = vadd.f32 %v2944_v18, %v2876_v63 }
 0x65c   : > { %v3653_v20 = vpop.f32.mrf.mxu1 }
 0x65d   : > { %2951 = vst.msk [vmem:[%s432_s16] sm:$0x1] %vm2950_vm15, %v2945_v19 }
 0x65e   : > { %v2947_v21 = vpop.f32.mrf.mxu1 }
 0x65f   : > { %3916 = shalt.err (!%p3913_p3)
}
 0x660   : > { %s3917_s15 = scalar_lea.hbm %s4705_s30, 16  ;;  %s3921_s23 = scalar_lea.hbm %s4759_s13, 32 }
 0x661   : > { %p3918_p4 = scmp.ne.s32.totalorder %s4705_s30, %s3917_s15  ;;  %p3922_p9 = scmp.lt.s32.totalorder %s4705_s30, %s4759_s13 }
 0x662   : > { %p3923_p10 = scmp.lt.s32.totalorder %s3921_s23, %s3917_s15 }
 0x663   : > { %p3919_p7 = pnand %p3918_p4, %p4078_p5 }
 0x664   : > { %p3924_p11 = por %p3923_p10, %p3922_p9 }
 0x665   : > { %p3920_p8 = pneg %p3919_p7 }
 0x667   : > { %p3925_p12 = pnand %p3924_p11, %p3920_p8 }
 0x669   : > { %3928 = shalt.err (!%p3925_p12)
}
 0x66a   : > { %3660 = dma.vmem_to_hbm [thread:$0]  (%p4078_p5), %s4707_s20, 16, %s4705_s30, %s2953_s27   ;;  %v3654_v22 = vpop.f32.mrf.mxu1 }
 0x66b PF: > { %p3666_p13 = scmp.ge.s32.totalorder %s3963_s28, 2  ;;  %s2977_s29 = sand.u32 1, %s3951_s25  }
 0x66c   : > { %s2978_s0 = scalar_lea.sflag [#allocation4], %s2977_s29 }
 0x66d   : > { %p3663_p0 = pnand %p3666_p13, %p4082_p6 }
 0x66f   : > { %p3664_p1 = pneg %p3663_p0 }
 0x671   : > { %3946 = dma.done.wait (%p3664_p1), %s2978_s0, 16  }
 0x672   : > { %3948 = vsyncadd (%p3664_p1), %s2978_s0, 4294967280  ;;  %s4767_s24 = sld [smem:[#allocation6_spill]]  ;;  %p23_p2 = scmp.ge.s32.totalorder %s4065_s14, 4  }
 0x673   : > { %s4768_s27 = sld [smem:[#allocation7_spill]]  ;;  %s4769_s25 = smov %s3955_s26 }
 0x674   : > { %s4771_s28 = smov %s4065_s14  ;;  %25 = sbr.rel (!%p23_p2) target bundleno = 5 (0x5), region = 124 }
 0x678   : > { %s4770_s26 = smov %s4767_s24 }
 0x679   :  { %2982 = vsyncpa [#allocation4], 1 }
 0x67a   :  { %2984 = vsyncpa [#allocation4 + $0x1], 1 }

</bundles_post_ra>
